<compile_context>
chip_gen: v7x
topology: tpu7x:2x2x1
jax: 0.10.0
libtpu: 0.0.40
codegen_flags: <defaults>
</compile_context>

<pallas_src>
import jax
import jax.numpy as jnp
from jax import lax
from jax.experimental import pallas as pl
from jax.experimental.pallas import tpu as pltpu


def _round_up(x, m):
    return ((x + m - 1) // m) * m


# ----------------------------------------------------------------------------
# Pallas kernel: one grid step per batch block.  Time-chunked input projection
# (double-buffered VMEM scratch) overlapped with the unrolled LSTM recurrence,
# masked packed-sequence state/sum updates, and the pre-scaled classifier.
# ----------------------------------------------------------------------------
def lstm_kernel(x_ref, sl_ref, wih_ref, whh_ref, b_ref, wl_ref, bl_ref,
                out_ref, gx_sc):
    Bb = out_ref.shape[0]                     # batch rows in this block
    H4 = whh_ref.shape[1]                     # 4 * H_pad (lane aligned)
    H = H4 // 4
    TB = x_ref.shape[0]                       # T_pad * Bb time-major rows
    T = TB // Bb
    Tc_rows = gx_sc.shape[1]                  # Tc * Bb rows per chunk
    Tc = Tc_rows // Bb
    n_chunks = T // Tc                        # wrapper guarantees divisibility

    sl = sl_ref[...]                          # (Bb, 1) int32 sequence lengths

    def project(row, slot):
        """Input projection for one Tc-step chunk (independent of h-chain)."""
        gx_sc[slot] = (jnp.dot(x_ref[pl.ds(row, Tc_rows), :], wih_ref[...],
                               preferred_element_type=jnp.float32)
                       + b_ref[...])                          # (Tc*Bb, 4H) f32

    # Prime chunk 0 into buffer 0.
    project(0, 0)

    def chunk_body(k, carry):
        h, c, acc = carry
        slot = k % 2

        # Issue the projection for chunk k+1 *before* the recurrence over
        # chunk k: it has no dependence on the h-chain, so the MXU fills the
        # cycles left idle by the latency-bound h @ W_hh dependence chain.
        @pl.when(k + 1 < n_chunks)
        def _():
            project(pl.multiple_of((k + 1) * Tc_rows, Tc_rows), 1 - slot)

        def step(s, carry2):
            h, c, acc = carry2
            t = k * Tc + s
            row = pl.multiple_of(s * Bb, Bb)
            gates = gx_sc[slot, pl.ds(row, Bb), :] + jnp.dot(
                h.astype(jnp.bfloat16), whh_ref[...],
                preferred_element_type=jnp.float32)           # (Bb, 4H)

            # PyTorch gate order [i, f, g, o]; H is lane aligned (mult. of
            # 128) so every slice is a full-vreg, unmasked slice.
            i_g = jax.nn.sigmoid(gates[:, 0 * H:1 * H])
            f_g = jax.nn.sigmoid(gates[:, 1 * H:2 * H])
            g_g = jnp.tanh(gates[:, 2 * H:3 * H])
            o_g = jax.nn.sigmoid(gates[:, 3 * H:4 * H])

            c_new = f_g * c + i_g * g_g
            h_new = o_g * jnp.tanh(c_new)

            # packed-sequence semantics: only active rows advance / contribute
            m = sl > t                                        # (Bb, 1) bool
            h = jnp.where(m, h_new, h)
            c = jnp.where(m, c_new, c)
            acc = acc + jnp.where(m, h_new, 0.0)
            return h, c, acc

        # Bounded unroll: keeps LLO visibility without blowing the vreg file
        # at production T / H.
        return lax.fori_loop(0, Tc, step, (h, c, acc), unroll=min(Tc, 8))

    z = jnp.zeros((Bb, H), jnp.float32)
    _, _, acc = lax.fori_loop(0, n_chunks, chunk_body, (z, z, z))

    # Classifier.  W_lin^T was pre-scaled by 1/max(seq_len) in the wrapper and
    # zero-padded to (H_pad, C_pad); padded acc columns are exactly zero.
    # Lane-dense (Bb, C_pad) store.
    out_ref[...] = (jnp.dot(acc.astype(jnp.bfloat16), wl_ref[...],
                            preferred_element_type=jnp.float32)
                    + bl_ref[...])


# ----------------------------------------------------------------------------
# Wrapper: lane/sublane padding, per-gate weight padding, blocked time-major
# embedding gather, bf16 weight casts, pallas_call.
# ----------------------------------------------------------------------------
def lstm_net_forward(x_tokens, seq_len, params, *, b_blk=None, tc=None):
    embedding = params["embedding"]                 # (V, E) f32
    wih_t = params["w_ih_t"]                        # (E, 4H) f32
    whh_t = params["w_hh_t"]                        # (H, 4H) f32
    bias = params["bias"]                           # (1, 4H) f32
    wl_t = params["w_lin_t"]                        # (H, C) f32
    bl = params["b_lin"]                            # (1, C) f32

    B, T = x_tokens.shape
    E = embedding.shape[1]
    H = whh_t.shape[0]
    C = wl_t.shape[1]

    # Lane / sublane alignment: batch -> 8, E/H/C -> 128 (so 4H -> 512).
    B_pad = _round_up(B, 8)
    E_pad = _round_up(E, 128)
    H_pad = _round_up(H, 128)
    C_pad = _round_up(C, 128)
    H4 = 4 * H_pad

    if b_blk is None:
        # v7x megacore: with >= 16 padded batch rows split into two blocks so
        # the "parallel" grid axis shards across both TensorCores.  On
        # single-TC chips (v5e/v6e) keep one block: extra grid steps are a
        # serial loop that only re-streams weights.
        b_blk = B_pad if B_pad < 16 else _round_up(B_pad // 2, 8)
    n_b = pl.cdiv(B_pad, b_blk)
    B_pad = n_b * b_blk

    if tc is None:
        tc = min(T, 16)                 # projection chunk length (time steps)
    T_pad = _round_up(T, tc)            # padded steps are masked out below

    seq_len = seq_len.astype(jnp.int32)
    # pad_packed_sequence pads to max(seq_len); torch.mean divides by it.
    # (If a caller pads the token tensor past max(seq_len) the extra steps
    # are masked and still divided by max(seq_len), matching PyTorch.)
    denom = jnp.max(seq_len).astype(jnp.float32)

    # pad batch/time: token 0 == zeroed embedding row, length 0 == fully masked
    tok = jnp.zeros((B_pad, T_pad), x_tokens.dtype).at[:B, :T].set(x_tokens)
    sl = jnp.zeros((B_pad,), jnp.int32).at[:B].set(seq_len)

    # Gather the embedding DIRECTLY into the blocked time-major layout the
    # kernel consumes (n_b, T_pad*b_blk, E_pad): row t*b_blk + b of block j is
    # step t of sequence j*b_blk + b.  Only the tiny token-id array is permuted.
    tok_blk = (tok.reshape(n_b, b_blk, T_pad)
                  .transpose(0, 2, 1)
                  .reshape(n_b, T_pad * b_blk))
    emb_pad = jnp.zeros((embedding.shape[0], E_pad),
                        jnp.float32).at[:, :E].set(embedding)
    x_blk = jnp.take(emb_pad.astype(jnp.bfloat16), tok_blk, axis=0)

    # Per-block sequence lengths (replaces the old T-length mask stream).
    sl_blk = sl.reshape(n_b, b_blk, 1)

    # Per-gate zero padding of the 4H axis so gate g lives at [g*H_pad, ...).
    def pad_gates(w, rows_pad):
        rows = w.shape[0]
        w4 = w.reshape(rows, 4, H)
        out = jnp.zeros((rows_pad, 4, H_pad), w.dtype)
        out = out.at[:rows, :, :H].set(w4)
        return out.reshape(rows_pad, 4 * H_pad)

    wih_pad = pad_gates(wih_t, E_pad).astype(jnp.bfloat16)     # (E_pad, 4H)
    whh_pad = pad_gates(whh_t, H_pad).astype(jnp.bfloat16)     # (H_pad, 4H)
    b_pad = pad_gates(bias, 1)                                  # (1, 4H) f32

    # Fold 1/max(seq_len) into W_lin^T; lane-pad the classifier.
    wl_pad = jnp.zeros((H_pad, C_pad),
                       jnp.float32).at[:H, :C].set(wl_t / denom)
    wl_pad = wl_pad.astype(jnp.bfloat16)
    bl_pad = jnp.zeros((1, C_pad), jnp.float32).at[:, :C].set(bl)

    # Weights have constant index maps -> single-buffer them (no re-fetch).
    w_buf = pl.Buffered(1)
    grid_spec = pltpu.PrefetchScalarGridSpec(
        num_scalar_prefetch=0,
        grid=(n_b,),
        in_specs=[
            pl.BlockSpec((None, T_pad * b_blk, E_pad),
                         lambda j: (j, 0, 0)),                        # x slab
            pl.BlockSpec((None, b_blk, 1), lambda j: (j, 0, 0)),      # seq_len
            pl.BlockSpec((E_pad, H4), lambda j: (0, 0),
                         pipeline_mode=w_buf),                        # W_ih^T
            pl.BlockSpec((H_pad, H4), lambda j: (0, 0),
                         pipeline_mode=w_buf),                        # W_hh^T
            pl.BlockSpec((1, H4), lambda j: (0, 0),
                         pipeline_mode=w_buf),                        # bias
            pl.BlockSpec((H_pad, C_pad), lambda j: (0, 0),
                         pipeline_mode=w_buf),                        # W_lin^T/denom
            pl.BlockSpec((1, C_pad), lambda j: (0, 0),
                         pipeline_mode=w_buf),                        # b_lin
        ],
        out_specs=pl.BlockSpec((b_blk, C_pad), lambda j: (j, 0)),
        scratch_shapes=[
            pltpu.VMEM((2, tc * b_blk, H4), jnp.float32),   # chunked gates_x
        ],
    )

    out_pad = pl.pallas_call(
        lstm_kernel,
        out_shape=jax.ShapeDtypeStruct((B_pad, C_pad), jnp.float32),
        grid_spec=grid_spec,
        compiler_params=pltpu.CompilerParams(
            dimension_semantics=("parallel",),       # batch blocks -> 2 TCs (v7x)
            vmem_limit_bytes=64 * 1024 * 1024),      # fits v5e/v6e/v7x physical
    )(x_blk, sl_blk, wih_pad, whh_pad, b_pad, wl_pad, bl_pad)

    return out_pad[:B, :C]


# ----------------------------------------------------------------------------
# Pure-JAX f32 reference (true module math) for the correctness check.
# ----------------------------------------------------------------------------
def ref_forward(x_tokens, seq_len, params):
    x_embed = params["embedding"][x_tokens].astype(jnp.float32)   # (B, T, E)
    B, T, _ = x_embed.shape
    H = params["w_hh_t"].shape[0]
    h0 = jnp.zeros((B, H), jnp.float32)
    c0 = jnp.zeros((B, H), jnp.float32)

    def step(carry, inp):
        h, c = carry
        x_t, t = inp
        gates = x_t @ params["w_ih_t"] + h @ params["w_hh_t"] + params["bias"]
        i_g = jax.nn.sigmoid(gates[:, 0 * H:1 * H])
        f_g = jax.nn.sigmoid(gates[:, 1 * H:2 * H])
        g_g = jnp.tanh(gates[:, 2 * H:3 * H])
        o_g = jax.nn.sigmoid(gates[:, 3 * H:4 * H])
        c_new = f_g * c + i_g * g_g
        h_new = o_g * jnp.tanh(c_new)
        mask = (t < seq_len)[:, None].astype(jnp.float32)
        h = mask * h_new + (1.0 - mask) * h
        c = mask * c_new + (1.0 - mask) * c
        return (h, c), mask * h_new

    (_, _), hs = jax.lax.scan(step, (h0, c0),
                              (jnp.transpose(x_embed, (1, 0, 2)),
                               jnp.arange(T)))
    mean_h = hs.sum(axis=0) / jnp.max(seq_len).astype(jnp.float32)
    return mean_h @ params["w_lin_t"] + params["b_lin"]


# ----------------------------------------------------------------------------
def make_params(key, vocab_size, embed_dim, hidden_size, num_classes):
    ks = jax.random.split(key, 7)
    scale = 0.1
    embedding = scale * jax.random.normal(ks[0], (vocab_size, embed_dim),
                                          jnp.float32)
    embedding = embedding.at[0].set(0.0)        # padding_idx=0 row zeroed
    w_ih = scale * jax.random.normal(ks[1], (4 * hidden_size, embed_dim),
                                     jnp.float32)
    w_hh = scale * jax.random.normal(ks[2], (4 * hidden_size, hidden_size),
                                     jnp.float32)
    b_ih = scale * jax.random.normal(ks[3], (4 * hidden_size,), jnp.float32)
    b_hh = scale * jax.random.normal(ks[4], (4 * hidden_size,), jnp.float32)
    w_lin = scale * jax.random.normal(ks[5], (num_classes, hidden_size),
                                      jnp.float32)
    b_lin = scale * jax.random.normal(ks[6], (num_classes,), jnp.float32)
    return {
        "embedding": embedding,
        "w_ih_t": w_ih.T,                        # (E, 4H)
        "w_hh_t": w_hh.T,                        # (H, 4H)
        "bias": (b_ih + b_hh).reshape(1, -1),    # (1, 4H)
        "w_lin_t": w_lin.T,                      # (H, C)
        "b_lin": b_lin.reshape(1, -1),           # (1, C)
    }


if __name__ == "__main__":
    # small shapes consistent with the module: B=2, T=8, E=16, H=32, C=4
    B, T = 2, 8
    vocab_size, embed_dim, hidden_size, num_classes = 50, 16, 32, 4

    key = jax.random.PRNGKey(0)
    k_tok, k_par = jax.random.split(key)
    x_tokens = jax.random.randint(k_tok, (B, T), 1, vocab_size, jnp.int32)
    seq_len = jnp.array([8, 5], jnp.int32)       # variable lengths, max == T
    # zero out the padded positions' tokens like a real padded batch
    pos = jnp.arange(T)[None, :]
    x_tokens = jnp.where(pos < seq_len[:, None], x_tokens, 0)

    params = make_params(k_par, vocab_size, embed_dim, hidden_size, num_classes)

    # tc=4 -> 2 projection chunks, exercising the double-buffered overlap path.
    out = lstm_net_forward(x_tokens, seq_len, params, tc=4)
    out = jax.block_until_ready(out)

    ref = jax.block_until_ready(ref_forward(x_tokens, seq_len, params))
    assert out.shape == (B, num_classes)
    # bf16 weights/activations on the MXU -> bf16-level tolerance vs f32 ref
    assert jnp.allclose(out, ref, atol=2e-2, rtol=2e-2), (out, ref)

    print("KERNEL_OK")
</pallas_src>

<mosaic_0001>
module attributes {stable_mosaic.version = 11 : i64} {
  func.func @lstm_kernel(%arg0: i32, %arg1: memref<1x64x128xbf16, #tpu.memory_space<vmem>>, %arg2: memref<1x8x1xi32, #tpu.memory_space<vmem>>, %arg3: memref<128x512xbf16, #tpu.memory_space<vmem>>, %arg4: memref<128x512xbf16, #tpu.memory_space<vmem>>, %arg5: memref<1x512xf32, #tpu.memory_space<vmem>>, %arg6: memref<128x128xbf16, #tpu.memory_space<vmem>>, %arg7: memref<1x128xf32, #tpu.memory_space<vmem>>, %arg8: memref<8x128xf32, #tpu.memory_space<vmem>>, %arg9: memref<2x32x512xf32, #tpu.memory_space<vmem>>) attributes {dimension_semantics = [#tpu.dimension_semantics<parallel>], iteration_bounds = array<i64: 1>, scalar_prefetch = 0 : i64, scratch_operands = 1 : i64, tpu.core_type = #tpu.core_type<tc>, window_params = [{transform_indices = @transform_0, window_bounds = array<i64: 1, 64, 128>}, {transform_indices = @transform_1, window_bounds = array<i64: 1, 8, 1>}, {pipeline_mode = #tpu.pipeline_mode<synchronous>, transform_indices = @transform_2, window_bounds = array<i64: 128, 512>}, {pipeline_mode = #tpu.pipeline_mode<synchronous>, transform_indices = @transform_3, window_bounds = array<i64: 128, 512>}, {pipeline_mode = #tpu.pipeline_mode<synchronous>, transform_indices = @transform_4, window_bounds = array<i64: 1, 512>}, {pipeline_mode = #tpu.pipeline_mode<synchronous>, transform_indices = @transform_5, window_bounds = array<i64: 128, 128>}, {pipeline_mode = #tpu.pipeline_mode<synchronous>, transform_indices = @transform_6, window_bounds = array<i64: 1, 128>}, {transform_indices = @transform_7, window_bounds = array<i64: 8, 128>}]} {
    %c0 = arith.constant 0 : index
    %c0_0 = arith.constant 0 : index
    %c0_1 = arith.constant 0 : index
    %0 = vector.load %arg2[%c0, %c0_0, %c0_1] : memref<1x8x1xi32, #tpu.memory_space<vmem>>, vector<1x8x1xi32>
    %1 = vector.shape_cast %0 : vector<1x8x1xi32> to vector<8x1xi32>
    %c0_2 = arith.constant 0 : index
    %c0_3 = arith.constant 0 : index
    %c0_4 = arith.constant 0 : index
    %2 = vector.load %arg1[%c0_2, %c0_3, %c0_4] : memref<1x64x128xbf16, #tpu.memory_space<vmem>>, vector<1x32x128xbf16>
    %3 = vector.shape_cast %2 : vector<1x32x128xbf16> to vector<32x128xbf16>
    %c0_5 = arith.constant 0 : index
    %c0_6 = arith.constant 0 : index
    %4 = vector.load %arg3[%c0_5, %c0_6] : memref<128x512xbf16, #tpu.memory_space<vmem>>, vector<128x512xbf16>
    %cst = arith.constant dense<0.000000e+00> : vector<32x512xf32>
    %5 = tpu.matmul %3, %4, %cst {dimension_numbers = #tpu.dot_dimension_numbers<[1], [0], [0], [1], [0, 0, 1, 1], [], []>} : vector<32x128xbf16>, vector<128x512xbf16>, vector<32x512xf32> -> vector<32x512xf32>
    %c0_7 = arith.constant 0 : index
    %c0_8 = arith.constant 0 : index
    %6 = vector.load %arg5[%c0_7, %c0_8] : memref<1x512xf32, #tpu.memory_space<vmem>>, vector<1x512xf32>
    %7 = vector.broadcast %6 : vector<1x512xf32> to vector<32x512xf32>
    %8 = arith.addf %5, %7 : vector<32x512xf32>
    %c0_9 = arith.constant 0 : index
    %c0_10 = arith.constant 0 : index
    %c0_11 = arith.constant 0 : index
    %9 = vector.load %arg9[%c0_9, %c0_10, %c0_11] : memref<2x32x512xf32, #tpu.memory_space<vmem>>, vector<1x32x512xf32>
    %10 = vector.shape_cast %9 : vector<1x32x512xf32> to vector<32x512xf32>
    %11 = vector.shape_cast %8 : vector<32x512xf32> to vector<1x32x512xf32>
    tpu.vector_store %arg9[%c0_9, %c0_10, %c0_11], %11 {strides = array<i32>} : memref<2x32x512xf32, #tpu.memory_space<vmem>>, vector<1x32x512xf32>,
    %cst_12 = arith.constant 0.000000e+00 : f32
    %12 = vector.broadcast %cst_12 : f32 to vector<8x128xf32>
    %c0_i32 = arith.constant 0 : i32
    %c2_i32 = arith.constant 2 : i32
    %13 = arith.addi %c0_i32, %c2_i32 : i32
    %c1_i32 = arith.constant 1 : i32
    %14:3 = scf.for %arg10 = %c0_i32 to %13 step %c1_i32 iter_args(%arg11 = %12, %arg12 = %12, %arg13 = %12) -> (vector<8x128xf32>, vector<8x128xf32>, vector<8x128xf32>)  : i32 {
      %c2_i32_21 = arith.constant 2 : i32
      %c0_i32_22 = arith.constant 0 : i32
      %22 = arith.cmpi eq, %c2_i32_21, %c0_i32_22 : i32
      %c1_i32_23 = arith.constant 1 : i32
      %23 = arith.select %22, %c1_i32_23, %c2_i32_21 : i32
      %24 = arith.remsi %arg10, %23 : i32
      %c0_i32_24 = arith.constant 0 : i32
      %25 = arith.cmpi ne, %24, %c0_i32_24 : i32
      %c0_i32_25 = arith.constant 0 : i32
      %26 = arith.cmpi slt, %24, %c0_i32_25 : i32
      %c0_i32_26 = arith.constant 0 : i32
      %27 = arith.cmpi slt, %23, %c0_i32_26 : i32
      %28 = arith.xori %26, %27 : i1
      %29 = arith.andi %28, %25 : i1
      %30 = arith.addi %24, %23 : i32
      %31 = arith.select %29, %30, %24 : i32
      %c1_i32_27 = arith.constant 1 : i32
      %32 = arith.addi %arg10, %c1_i32_27 : i32
      %c2_i32_28 = arith.constant 2 : i32
      %33 = arith.cmpi slt, %32, %c2_i32_28 : i32
      %34 = arith.extui %33 : i1 to i32
      %c0_i32_29 = arith.constant 0 : i32
      %35 = arith.cmpi ne, %34, %c0_i32_29 : i32
      scf.if %35 {
        %c1_i32_72 = arith.constant 1 : i32
        %236 = arith.addi %arg10, %c1_i32_72 : i32
        %c32_i32 = arith.constant 32 : i32
        %237 = arith.muli %236, %c32_i32 : i32
        %238 = tpu.assume_multiple %237, 32 : i32
        %c1_i32_73 = arith.constant 1 : i32
        %239 = arith.subi %c1_i32_73, %31 : i32
        %c0_74 = arith.constant 0 : index
        %240 = arith.index_cast %238 : i32 to index
        %c0_75 = arith.constant 0 : index
        %241 = vector.load %arg1[%c0_74, %240, %c0_75] : memref<1x64x128xbf16, #tpu.memory_space<vmem>>, vector<1x32x128xbf16>
        %242 = vector.shape_cast %241 : vector<1x32x128xbf16> to vector<32x128xbf16>
        %c0_76 = arith.constant 0 : index
        %c0_77 = arith.constant 0 : index
        %243 = vector.load %arg3[%c0_76, %c0_77] : memref<128x512xbf16, #tpu.memory_space<vmem>>, vector<128x512xbf16>
        %cst_78 = arith.constant dense<0.000000e+00> : vector<32x512xf32>
        %244 = tpu.matmul %242, %243, %cst_78 {dimension_numbers = #tpu.dot_dimension_numbers<[1], [0], [0], [1], [0, 0, 1, 1], [], []>} : vector<32x128xbf16>, vector<128x512xbf16>, vector<32x512xf32> -> vector<32x512xf32>
        %c0_79 = arith.constant 0 : index
        %c0_80 = arith.constant 0 : index
        %245 = vector.load %arg5[%c0_79, %c0_80] : memref<1x512xf32, #tpu.memory_space<vmem>>, vector<1x512xf32>
        %246 = vector.broadcast %245 : vector<1x512xf32> to vector<32x512xf32>
        %247 = arith.addf %244, %246 : vector<32x512xf32>
        %248 = arith.index_cast %239 : i32 to index
        %c0_81 = arith.constant 0 : index
        %c0_82 = arith.constant 0 : index
        %249 = vector.load %arg9[%248, %c0_81, %c0_82] : memref<2x32x512xf32, #tpu.memory_space<vmem>>, vector<1x32x512xf32>
        %250 = vector.shape_cast %249 : vector<1x32x512xf32> to vector<32x512xf32>
        %251 = vector.shape_cast %247 : vector<32x512xf32> to vector<1x32x512xf32>
        tpu.vector_store %arg9[%248, %c0_81, %c0_82], %251 {strides = array<i32>} : memref<2x32x512xf32, #tpu.memory_space<vmem>>, vector<1x32x512xf32>,
      } else {
      }
      %c0_i32_30 = arith.constant 0 : i32
      %c4_i32 = arith.constant 4 : i32
      %36 = arith.muli %arg10, %c4_i32 : i32
      %37 = arith.addi %36, %c0_i32_30 : i32
      %c8_i32 = arith.constant 8 : i32
      %38 = arith.muli %c0_i32_30, %c8_i32 : i32
      %39 = tpu.assume_multiple %38, 8 : i32
      %40 = arith.index_cast %31 : i32 to index
      %41 = arith.index_cast %39 : i32 to index
      %c0_31 = arith.constant 0 : index
      %42 = vector.load %arg9[%40, %41, %c0_31] : memref<2x32x512xf32, #tpu.memory_space<vmem>>, vector<1x8x512xf32>
      %43 = vector.shape_cast %42 : vector<1x8x512xf32> to vector<8x512xf32>
      %44 = arith.truncf %arg11 : vector<8x128xf32> to vector<8x128xbf16>
      %c0_32 = arith.constant 0 : index
      %c0_33 = arith.constant 0 : index
      %45 = vector.load %arg4[%c0_32, %c0_33] : memref<128x512xbf16, #tpu.memory_space<vmem>>, vector<128x512xbf16>
      %cst_34 = arith.constant dense<0.000000e+00> : vector<8x512xf32>
      %46 = tpu.matmul %44, %45, %cst_34 {dimension_numbers = #tpu.dot_dimension_numbers<[1], [0], [0], [1], [0, 0, 1, 1], [], []>} : vector<8x128xbf16>, vector<128x512xbf16>, vector<8x512xf32> -> vector<8x512xf32>
      %47 = arith.addf %43, %46 : vector<8x512xf32>
      %48 = vector.extract_strided_slice %47 {offsets = [0, 0], sizes = [8, 128], strides = [1, 1]} : vector<8x512xf32> to vector<8x128xf32>
      %49 = arith.negf %48 : vector<8x128xf32>
      %50 = math.exp %49 : vector<8x128xf32>
      %cst_35 = arith.constant 1.000000e+00 : f32
      %51 = vector.broadcast %cst_35 : f32 to vector<8x128xf32>
      %52 = arith.addf %51, %50 : vector<8x128xf32>
      %53 = arith.divf %51, %52 : vector<8x128xf32>
      %54 = vector.extract_strided_slice %47 {offsets = [0, 128], sizes = [8, 128], strides = [1, 1]} : vector<8x512xf32> to vector<8x128xf32>
      %55 = arith.negf %54 : vector<8x128xf32>
      %56 = math.exp %55 : vector<8x128xf32>
      %cst_36 = arith.constant 1.000000e+00 : f32
      %57 = vector.broadcast %cst_36 : f32 to vector<8x128xf32>
      %58 = arith.addf %57, %56 : vector<8x128xf32>
      %59 = arith.divf %57, %58 : vector<8x128xf32>
      %60 = vector.extract_strided_slice %47 {offsets = [0, 256], sizes = [8, 128], strides = [1, 1]} : vector<8x512xf32> to vector<8x128xf32>
      %61 = math.tanh %60 : vector<8x128xf32>
      %62 = vector.extract_strided_slice %47 {offsets = [0, 384], sizes = [8, 128], strides = [1, 1]} : vector<8x512xf32> to vector<8x128xf32>
      %63 = arith.negf %62 : vector<8x128xf32>
      %64 = math.exp %63 : vector<8x128xf32>
      %cst_37 = arith.constant 1.000000e+00 : f32
      %65 = vector.broadcast %cst_37 : f32 to vector<8x128xf32>
      %66 = arith.addf %65, %64 : vector<8x128xf32>
      %67 = arith.divf %65, %66 : vector<8x128xf32>
      %68 = arith.mulf %59, %arg12 : vector<8x128xf32>
      %69 = arith.mulf %53, %61 : vector<8x128xf32>
      %70 = arith.addf %68, %69 : vector<8x128xf32>
      %71 = math.tanh %70 : vector<8x128xf32>
      %72 = arith.mulf %67, %71 : vector<8x128xf32>
      %73 = vector.broadcast %37 : i32 to vector<8x1xi32>
      %74 = arith.cmpi sgt, %1, %73 : vector<8x1xi32>
      %75 = vector.shape_cast %74 : vector<8x1xi1> to vector<8x1xi1>
      %76 = vector.broadcast %75 : vector<8x1xi1> to vector<8x128xi1>
      %77 = arith.select %76, %72, %arg11 : vector<8x128xi1>, vector<8x128xf32>
      %78 = vector.shape_cast %74 : vector<8x1xi1> to vector<8x1xi1>
      %79 = vector.broadcast %78 : vector<8x1xi1> to vector<8x128xi1>
      %80 = arith.select %79, %70, %arg12 : vector<8x128xi1>, vector<8x128xf32>
      %cst_38 = arith.constant 0.000000e+00 : f32
      %81 = vector.shape_cast %74 : vector<8x1xi1> to vector<8x1xi1>
      %82 = vector.broadcast %81 : vector<8x1xi1> to vector<8x128xi1>
      %83 = vector.broadcast %cst_38 : f32 to vector<8x128xf32>
      %84 = arith.select %82, %72, %83 : vector<8x128xi1>, vector<8x128xf32>
      %85 = arith.addf %arg13, %84 : vector<8x128xf32>
      %c1_i32_39 = arith.constant 1 : i32
      %c4_i32_40 = arith.constant 4 : i32
      %86 = arith.muli %arg10, %c4_i32_40 : i32
      %87 = arith.addi %86, %c1_i32_39 : i32
      %c8_i32_41 = arith.constant 8 : i32
      %88 = arith.muli %c1_i32_39, %c8_i32_41 : i32
      %89 = tpu.assume_multiple %88, 8 : i32
      %90 = arith.index_cast %31 : i32 to index
      %91 = arith.index_cast %89 : i32 to index
      %c0_42 = arith.constant 0 : index
      %92 = vector.load %arg9[%90, %91, %c0_42] : memref<2x32x512xf32, #tpu.memory_space<vmem>>, vector<1x8x512xf32>
      %93 = vector.shape_cast %92 : vector<1x8x512xf32> to vector<8x512xf32>
      %94 = arith.truncf %77 : vector<8x128xf32> to vector<8x128xbf16>
      %c0_43 = arith.constant 0 : index
      %c0_44 = arith.constant 0 : index
      %95 = vector.load %arg4[%c0_43, %c0_44] : memref<128x512xbf16, #tpu.memory_space<vmem>>, vector<128x512xbf16>
      %cst_45 = arith.constant dense<0.000000e+00> : vector<8x512xf32>
      %96 = tpu.matmul %94, %95, %cst_45 {dimension_numbers = #tpu.dot_dimension_numbers<[1], [0], [0], [1], [0, 0, 1, 1], [], []>} : vector<8x128xbf16>, vector<128x512xbf16>, vector<8x512xf32> -> vector<8x512xf32>
      %97 = arith.addf %93, %96 : vector<8x512xf32>
      %98 = vector.extract_strided_slice %97 {offsets = [0, 0], sizes = [8, 128], strides = [1, 1]} : vector<8x512xf32> to vector<8x128xf32>
      %99 = arith.negf %98 : vector<8x128xf32>
      %100 = math.exp %99 : vector<8x128xf32>
      %cst_46 = arith.constant 1.000000e+00 : f32
      %101 = vector.broadcast %cst_46 : f32 to vector<8x128xf32>
      %102 = arith.addf %101, %100 : vector<8x128xf32>
      %103 = arith.divf %101, %102 : vector<8x128xf32>
      %104 = vector.extract_strided_slice %97 {offsets = [0, 128], sizes = [8, 128], strides = [1, 1]} : vector<8x512xf32> to vector<8x128xf32>
      %105 = arith.negf %104 : vector<8x128xf32>
      %106 = math.exp %105 : vector<8x128xf32>
      %cst_47 = arith.constant 1.000000e+00 : f32
      %107 = vector.broadcast %cst_47 : f32 to vector<8x128xf32>
      %108 = arith.addf %107, %106 : vector<8x128xf32>
      %109 = arith.divf %107, %108 : vector<8x128xf32>
      %110 = vector.extract_strided_slice %97 {offsets = [0, 256], sizes = [8, 128], strides = [1, 1]} : vector<8x512xf32> to vector<8x128xf32>
      %111 = math.tanh %110 : vector<8x128xf32>
      %112 = vector.extract_strided_slice %97 {offsets = [0, 384], sizes = [8, 128], strides = [1, 1]} : vector<8x512xf32> to vector<8x128xf32>
      %113 = arith.negf %112 : vector<8x128xf32>
      %114 = math.exp %113 : vector<8x128xf32>
      %cst_48 = arith.constant 1.000000e+00 : f32
      %115 = vector.broadcast %cst_48 : f32 to vector<8x128xf32>
      %116 = arith.addf %115, %114 : vector<8x128xf32>
      %117 = arith.divf %115, %116 : vector<8x128xf32>
      %118 = arith.mulf %109, %80 : vector<8x128xf32>
      %119 = arith.mulf %103, %111 : vector<8x128xf32>
      %120 = arith.addf %118, %119 : vector<8x128xf32>
      %121 = math.tanh %120 : vector<8x128xf32>
      %122 = arith.mulf %117, %121 : vector<8x128xf32>
      %123 = vector.broadcast %87 : i32 to vector<8x1xi32>
      %124 = arith.cmpi sgt, %1, %123 : vector<8x1xi32>
      %125 = vector.shape_cast %124 : vector<8x1xi1> to vector<8x1xi1>
      %126 = vector.broadcast %125 : vector<8x1xi1> to vector<8x128xi1>
      %127 = arith.select %126, %122, %77 : vector<8x128xi1>, vector<8x128xf32>
      %128 = vector.shape_cast %124 : vector<8x1xi1> to vector<8x1xi1>
      %129 = vector.broadcast %128 : vector<8x1xi1> to vector<8x128xi1>
      %130 = arith.select %129, %120, %80 : vector<8x128xi1>, vector<8x128xf32>
      %cst_49 = arith.constant 0.000000e+00 : f32
      %131 = vector.shape_cast %124 : vector<8x1xi1> to vector<8x1xi1>
      %132 = vector.broadcast %131 : vector<8x1xi1> to vector<8x128xi1>
      %133 = vector.broadcast %cst_49 : f32 to vector<8x128xf32>
      %134 = arith.select %132, %122, %133 : vector<8x128xi1>, vector<8x128xf32>
      %135 = arith.addf %85, %134 : vector<8x128xf32>
      %c2_i32_50 = arith.constant 2 : i32
      %c4_i32_51 = arith.constant 4 : i32
      %136 = arith.muli %arg10, %c4_i32_51 : i32
      %137 = arith.addi %136, %c2_i32_50 : i32
      %c8_i32_52 = arith.constant 8 : i32
      %138 = arith.muli %c2_i32_50, %c8_i32_52 : i32
      %139 = tpu.assume_multiple %138, 8 : i32
      %140 = arith.index_cast %31 : i32 to index
      %141 = arith.index_cast %139 : i32 to index
      %c0_53 = arith.constant 0 : index
      %142 = vector.load %arg9[%140, %141, %c0_53] : memref<2x32x512xf32, #tpu.memory_space<vmem>>, vector<1x8x512xf32>
      %143 = vector.shape_cast %142 : vector<1x8x512xf32> to vector<8x512xf32>
      %144 = arith.truncf %127 : vector<8x128xf32> to vector<8x128xbf16>
      %c0_54 = arith.constant 0 : index
      %c0_55 = arith.constant 0 : index
      %145 = vector.load %arg4[%c0_54, %c0_55] : memref<128x512xbf16, #tpu.memory_space<vmem>>, vector<128x512xbf16>
      %cst_56 = arith.constant dense<0.000000e+00> : vector<8x512xf32>
      %146 = tpu.matmul %144, %145, %cst_56 {dimension_numbers = #tpu.dot_dimension_numbers<[1], [0], [0], [1], [0, 0, 1, 1], [], []>} : vector<8x128xbf16>, vector<128x512xbf16>, vector<8x512xf32> -> vector<8x512xf32>
      %147 = arith.addf %143, %146 : vector<8x512xf32>
      %148 = vector.extract_strided_slice %147 {offsets = [0, 0], sizes = [8, 128], strides = [1, 1]} : vector<8x512xf32> to vector<8x128xf32>
      %149 = arith.negf %148 : vector<8x128xf32>
      %150 = math.exp %149 : vector<8x128xf32>
      %cst_57 = arith.constant 1.000000e+00 : f32
      %151 = vector.broadcast %cst_57 : f32 to vector<8x128xf32>
      %152 = arith.addf %151, %150 : vector<8x128xf32>
      %153 = arith.divf %151, %152 : vector<8x128xf32>
      %154 = vector.extract_strided_slice %147 {offsets = [0, 128], sizes = [8, 128], strides = [1, 1]} : vector<8x512xf32> to vector<8x128xf32>
      %155 = arith.negf %154 : vector<8x128xf32>
      %156 = math.exp %155 : vector<8x128xf32>
      %cst_58 = arith.constant 1.000000e+00 : f32
      %157 = vector.broadcast %cst_58 : f32 to vector<8x128xf32>
      %158 = arith.addf %157, %156 : vector<8x128xf32>
      %159 = arith.divf %157, %158 : vector<8x128xf32>
      %160 = vector.extract_strided_slice %147 {offsets = [0, 256], sizes = [8, 128], strides = [1, 1]} : vector<8x512xf32> to vector<8x128xf32>
      %161 = math.tanh %160 : vector<8x128xf32>
      %162 = vector.extract_strided_slice %147 {offsets = [0, 384], sizes = [8, 128], strides = [1, 1]} : vector<8x512xf32> to vector<8x128xf32>
      %163 = arith.negf %162 : vector<8x128xf32>
      %164 = math.exp %163 : vector<8x128xf32>
      %cst_59 = arith.constant 1.000000e+00 : f32
      %165 = vector.broadcast %cst_59 : f32 to vector<8x128xf32>
      %166 = arith.addf %165, %164 : vector<8x128xf32>
      %167 = arith.divf %165, %166 : vector<8x128xf32>
      %168 = arith.mulf %159, %130 : vector<8x128xf32>
      %169 = arith.mulf %153, %161 : vector<8x128xf32>
      %170 = arith.addf %168, %169 : vector<8x128xf32>
      %171 = math.tanh %170 : vector<8x128xf32>
      %172 = arith.mulf %167, %171 : vector<8x128xf32>
      %173 = vector.broadcast %137 : i32 to vector<8x1xi32>
      %174 = arith.cmpi sgt, %1, %173 : vector<8x1xi32>
      %175 = vector.shape_cast %174 : vector<8x1xi1> to vector<8x1xi1>
      %176 = vector.broadcast %175 : vector<8x1xi1> to vector<8x128xi1>
      %177 = arith.select %176, %172, %127 : vector<8x128xi1>, vector<8x128xf32>
      %178 = vector.shape_cast %174 : vector<8x1xi1> to vector<8x1xi1>
      %179 = vector.broadcast %178 : vector<8x1xi1> to vector<8x128xi1>
      %180 = arith.select %179, %170, %130 : vector<8x128xi1>, vector<8x128xf32>
      %cst_60 = arith.constant 0.000000e+00 : f32
      %181 = vector.shape_cast %174 : vector<8x1xi1> to vector<8x1xi1>
      %182 = vector.broadcast %181 : vector<8x1xi1> to vector<8x128xi1>
      %183 = vector.broadcast %cst_60 : f32 to vector<8x128xf32>
      %184 = arith.select %182, %172, %183 : vector<8x128xi1>, vector<8x128xf32>
      %185 = arith.addf %135, %184 : vector<8x128xf32>
      %c3_i32 = arith.constant 3 : i32
      %c4_i32_61 = arith.constant 4 : i32
      %186 = arith.muli %arg10, %c4_i32_61 : i32
      %187 = arith.addi %186, %c3_i32 : i32
      %c8_i32_62 = arith.constant 8 : i32
      %188 = arith.muli %c3_i32, %c8_i32_62 : i32
      %189 = tpu.assume_multiple %188, 8 : i32
      %190 = arith.index_cast %31 : i32 to index
      %191 = arith.index_cast %189 : i32 to index
      %c0_63 = arith.constant 0 : index
      %192 = vector.load %arg9[%190, %191, %c0_63] : memref<2x32x512xf32, #tpu.memory_space<vmem>>, vector<1x8x512xf32>
      %193 = vector.shape_cast %192 : vector<1x8x512xf32> to vector<8x512xf32>
      %194 = arith.truncf %177 : vector<8x128xf32> to vector<8x128xbf16>
      %c0_64 = arith.constant 0 : index
      %c0_65 = arith.constant 0 : index
      %195 = vector.load %arg4[%c0_64, %c0_65] : memref<128x512xbf16, #tpu.memory_space<vmem>>, vector<128x512xbf16>
      %cst_66 = arith.constant dense<0.000000e+00> : vector<8x512xf32>
      %196 = tpu.matmul %194, %195, %cst_66 {dimension_numbers = #tpu.dot_dimension_numbers<[1], [0], [0], [1], [0, 0, 1, 1], [], []>} : vector<8x128xbf16>, vector<128x512xbf16>, vector<8x512xf32> -> vector<8x512xf32>
      %197 = arith.addf %193, %196 : vector<8x512xf32>
      %198 = vector.extract_strided_slice %197 {offsets = [0, 0], sizes = [8, 128], strides = [1, 1]} : vector<8x512xf32> to vector<8x128xf32>
      %199 = arith.negf %198 : vector<8x128xf32>
      %200 = math.exp %199 : vector<8x128xf32>
      %cst_67 = arith.constant 1.000000e+00 : f32
      %201 = vector.broadcast %cst_67 : f32 to vector<8x128xf32>
      %202 = arith.addf %201, %200 : vector<8x128xf32>
      %203 = arith.divf %201, %202 : vector<8x128xf32>
      %204 = vector.extract_strided_slice %197 {offsets = [0, 128], sizes = [8, 128], strides = [1, 1]} : vector<8x512xf32> to vector<8x128xf32>
      %205 = arith.negf %204 : vector<8x128xf32>
      %206 = math.exp %205 : vector<8x128xf32>
      %cst_68 = arith.constant 1.000000e+00 : f32
      %207 = vector.broadcast %cst_68 : f32 to vector<8x128xf32>
      %208 = arith.addf %207, %206 : vector<8x128xf32>
      %209 = arith.divf %207, %208 : vector<8x128xf32>
      %210 = vector.extract_strided_slice %197 {offsets = [0, 256], sizes = [8, 128], strides = [1, 1]} : vector<8x512xf32> to vector<8x128xf32>
      %211 = math.tanh %210 : vector<8x128xf32>
      %212 = vector.extract_strided_slice %197 {offsets = [0, 384], sizes = [8, 128], strides = [1, 1]} : vector<8x512xf32> to vector<8x128xf32>
      %213 = arith.negf %212 : vector<8x128xf32>
      %214 = math.exp %213 : vector<8x128xf32>
      %cst_69 = arith.constant 1.000000e+00 : f32
      %215 = vector.broadcast %cst_69 : f32 to vector<8x128xf32>
      %216 = arith.addf %215, %214 : vector<8x128xf32>
      %217 = arith.divf %215, %216 : vector<8x128xf32>
      %218 = arith.mulf %209, %180 : vector<8x128xf32>
      %219 = arith.mulf %203, %211 : vector<8x128xf32>
      %220 = arith.addf %218, %219 : vector<8x128xf32>
      %221 = math.tanh %220 : vector<8x128xf32>
      %222 = arith.mulf %217, %221 : vector<8x128xf32>
      %223 = vector.broadcast %187 : i32 to vector<8x1xi32>
      %224 = arith.cmpi sgt, %1, %223 : vector<8x1xi32>
      %225 = vector.shape_cast %224 : vector<8x1xi1> to vector<8x1xi1>
      %226 = vector.broadcast %225 : vector<8x1xi1> to vector<8x128xi1>
      %227 = arith.select %226, %222, %177 : vector<8x128xi1>, vector<8x128xf32>
      %228 = vector.shape_cast %224 : vector<8x1xi1> to vector<8x1xi1>
      %229 = vector.broadcast %228 : vector<8x1xi1> to vector<8x128xi1>
      %230 = arith.select %229, %220, %180 : vector<8x128xi1>, vector<8x128xf32>
      %cst_70 = arith.constant 0.000000e+00 : f32
      %231 = vector.shape_cast %224 : vector<8x1xi1> to vector<8x1xi1>
      %232 = vector.broadcast %231 : vector<8x1xi1> to vector<8x128xi1>
      %233 = vector.broadcast %cst_70 : f32 to vector<8x128xf32>
      %234 = arith.select %232, %222, %233 : vector<8x128xi1>, vector<8x128xf32>
      %235 = arith.addf %185, %234 : vector<8x128xf32>
      %c4_i32_71 = arith.constant 4 : i32
      scf.yield %227, %230, %235 : vector<8x128xf32>, vector<8x128xf32>, vector<8x128xf32>
    }
    %c2_i32_13 = arith.constant 2 : i32
    %15 = arith.truncf %14#2 : vector<8x128xf32> to vector<8x128xbf16>
    %c0_14 = arith.constant 0 : index
    %c0_15 = arith.constant 0 : index
    %16 = vector.load %arg6[%c0_14, %c0_15] : memref<128x128xbf16, #tpu.memory_space<vmem>>, vector<128x128xbf16>
    %cst_16 = arith.constant dense<0.000000e+00> : vector<8x128xf32>
    %17 = tpu.matmul %15, %16, %cst_16 {dimension_numbers = #tpu.dot_dimension_numbers<[1], [0], [0], [1], [0, 0, 1, 1], [], []>} : vector<8x128xbf16>, vector<128x128xbf16>, vector<8x128xf32> -> vector<8x128xf32>
    %c0_17 = arith.constant 0 : index
    %c0_18 = arith.constant 0 : index
    %18 = vector.load %arg7[%c0_17, %c0_18] : memref<1x128xf32, #tpu.memory_space<vmem>>, vector<1x128xf32>
    %19 = vector.broadcast %18 : vector<1x128xf32> to vector<8x128xf32>
    %20 = arith.addf %17, %19 : vector<8x128xf32>
    %c0_19 = arith.constant 0 : index
    %c0_20 = arith.constant 0 : index
    %21 = vector.load %arg8[%c0_19, %c0_20] : memref<8x128xf32, #tpu.memory_space<vmem>>, vector<8x128xf32>
    tpu.vector_store %arg8[%c0_19, %c0_20], %20 {strides = array<i32>} : memref<8x128xf32, #tpu.memory_space<vmem>>, vector<8x128xf32>,
    return
  }
  func.func @transform_0(%arg0: i32) -> (i32, i32, i32) {
    %c0_i32 = arith.constant 0 : i32
    %c0_i32_0 = arith.constant 0 : i32
    %c0_i32_1 = arith.constant 0 : i32
    return %arg0, %c0_i32, %c0_i32_0 : i32, i32, i32
  }
  func.func @transform_1(%arg0: i32) -> (i32, i32, i32) {
    %c0_i32 = arith.constant 0 : i32
    %c0_i32_0 = arith.constant 0 : i32
    %c0_i32_1 = arith.constant 0 : i32
    return %arg0, %c0_i32, %c0_i32_0 : i32, i32, i32
  }
  func.func @transform_2(%arg0: i32) -> (i32, i32) {
    %c0_i32 = arith.constant 0 : i32
    %c0_i32_0 = arith.constant 0 : i32
    %c0_i32_1 = arith.constant 0 : i32
    return %c0_i32, %c0_i32_0 : i32, i32
  }
  func.func @transform_3(%arg0: i32) -> (i32, i32) {
    %c0_i32 = arith.constant 0 : i32
    %c0_i32_0 = arith.constant 0 : i32
    %c0_i32_1 = arith.constant 0 : i32
    return %c0_i32, %c0_i32_0 : i32, i32
  }
  func.func @transform_4(%arg0: i32) -> (i32, i32) {
    %c0_i32 = arith.constant 0 : i32
    %c0_i32_0 = arith.constant 0 : i32
    %c0_i32_1 = arith.constant 0 : i32
    return %c0_i32, %c0_i32_0 : i32, i32
  }
  func.func @transform_5(%arg0: i32) -> (i32, i32) {
    %c0_i32 = arith.constant 0 : i32
    %c0_i32_0 = arith.constant 0 : i32
    %c0_i32_1 = arith.constant 0 : i32
    return %c0_i32, %c0_i32_0 : i32, i32
  }
  func.func @transform_6(%arg0: i32) -> (i32, i32) {
    %c0_i32 = arith.constant 0 : i32
    %c0_i32_0 = arith.constant 0 : i32
    %c0_i32_1 = arith.constant 0 : i32
    return %c0_i32, %c0_i32_0 : i32, i32
  }
  func.func @transform_7(%arg0: i32) -> (i32, i32) {
    %c0_i32 = arith.constant 0 : i32
    %c0_i32_0 = arith.constant 0 : i32
    return %arg0, %c0_i32 : i32, i32
  }
}

</mosaic_0001>

<bundles_post_ra>
// kernel: tpu_custom_call.1
= control target key start
LH: loop header
LB: loop body
LE: loop exit
PB: predicated region body
PF: predicated region fallthrough
CT: control target
= control target key end

     0   :  { %12 = vsyncpa [#allocation4], 0  ;;  %s2946_s0 = inlined_call_operand.hbm [shape: bf16[1,64,128], index: 0, kind: input, shape index: {}]   ;;  %s2947_s1 = inlined_call_operand.hbm [shape: s32[1,8,1], index: 1, kind: input, shape index: {}]   ;;  %s2948_s2 = inlined_call_operand.hbm [shape: bf16[128,512], index: 2, kind: input, shape index: {}]   ;;  %s2949_s3 = inlined_call_operand.hbm [shape: bf16[128,512], index: 3, kind: input, shape index: {}]   ;;  %s2950_s4 = inlined_call_operand.hbm [shape: f32[1,512], index: 4, kind: input, shape index: {}]   ;;  %s2951_s5 = inlined_call_operand.hbm [shape: bf16[128,128], index: 5, kind: input, shape index: {}]   ;;  %s2952_s6 = inlined_call_operand.hbm [shape: f32[1,128], index: 6, kind: input, shape index: {}]   ;;  %s2953_s7 = inlined_call_operand.hbm [shape: f32[8,128], index: 7, kind: output, shape index: {}]  }
   0x1   :  { %13 = vsyncpa [#allocation7], 0 }
   0x2   :  { %14 = vsyncpa [#allocation10], 0 }
   0x3   :  { %15 = vsyncpa [#allocation13], 0 }
   0x4   :  { %16 = vsyncpa [#allocation5], 0  ;;  %s2413_s24 = smov [#allocation6]   ;;  %s2195_s28 = scalar_lea.hbm %s2947_s1, 128 }
   0x5   :  { %s35_s25 = sshll.u32 %s2413_s24, 4  ;;  %p2196_p0 = scmp.ne.s32.totalorder %s2947_s1, %s2195_s28  ;;  %s36_s25 = int_to_ptr.vmem [resolvable:$true] %s35_s25 }
   0x6   :  { %p2199_p1 = scmp.lt.u32.totalorder %s2195_s28, %s2947_s1 }
   0x8   :  { %p2201_p2 = pnand %p2199_p1, %p2196_p0 }
   0xa   :  { %2204 = shalt.err (!%p2201_p2)
}
   0xb   :  { %s2205_s10 = scalar_lea.vmem %s36_s25, 128  ;;  %p2210_p4 = scmp.lt.s32.totalorder %s36_s25, %s36_s25 }
   0xc   :  { %p2206_p3 = scmp.ne.s32.totalorder %s36_s25, %s2205_s10  ;;  %p2211_p5 = scmp.lt.s32.totalorder %s2205_s10, %s2205_s10 }
   0xe   :  { %p2212_p6 = por %p2211_p5, %p2210_p4 }
  0x10   :  { %p2213_p7 = pnand %p2212_p6, %p2206_p3 }
  0x12   :  { %2216 = shalt.err (!%p2213_p7)
}
  0x13   :  { %38 = dma.hbm_to_vmem [thread:$0]  %s2947_s1, 128, %s36_s25, [#allocation7]  }
  0x14   :  { %s2414_s13 = smov [#allocation9]   ;;  %s2217_s17 = scalar_lea.hbm %s2949_s3, 4096 }
  0x15   :  { %s56_s14 = sshll.u32 %s2414_s13, 4  ;;  %p2218_p8 = scmp.ne.s32.totalorder %s2949_s3, %s2217_s17  ;;  %s57_s14 = int_to_ptr.vmem [resolvable:$true] %s56_s14 }
  0x16   :  { %p2221_p9 = scmp.lt.u32.totalorder %s2217_s17, %s2949_s3 }
  0x18   :  { %p2223_p10 = pnand %p2221_p9, %p2218_p8 }
  0x1a   :  { %2226 = shalt.err (!%p2223_p10)
}
  0x1b   :  { %s2227_s22 = scalar_lea.vmem %s57_s14, 4096  ;;  %p2232_p12 = scmp.lt.s32.totalorder %s57_s14, %s57_s14 }
  0x1c   :  { %p2228_p11 = scmp.ne.s32.totalorder %s57_s14, %s2227_s22  ;;  %p2233_p13 = scmp.lt.s32.totalorder %s2227_s22, %s2227_s22 }
  0x1e   :  { %p2234_p0 = por %p2233_p13, %p2232_p12 }
  0x20   :  { %p2235_p1 = pnand %p2234_p0, %p2228_p11 }
  0x22   :  { %2238 = shalt.err (!%p2235_p1)
}
  0x23   :  { %s2415_s1 = smov 256   ;;  %s2416_s23 = smov 16  }
  0x24   :  { %62 = dma.hbm_to_vmem [thread:$0]  %s2949_s3, 4096, %s57_s14, [#allocation10], %s2415_s1, %s2415_s1, %s2416_s23  }
  0x25   :  { %s2417_s26 = smov [#allocation12]   ;;  %s2418_s28 = smov [#allocation3]  }
  0x26   :  { %s78_s27 = sshll.u32 %s2417_s26, 4  ;;  %s22_s29 = sshll.u32 %s2418_s28, 4  ;;  %s79_s27 = int_to_ptr.vmem [resolvable:$true] %s78_s27  ;;  %s2497_s29 = int_to_ptr.vmem [resolvable:$true] %s22_s29 }
  0x27   :  { %s2239_s9 = scalar_lea.hbm %s2951_s5, 1024 }
  0x28   :  { %p2240_p2 = scmp.ne.s32.totalorder %s2951_s5, %s2239_s9  ;;  %p2243_p3 = scmp.lt.u32.totalorder %s2239_s9, %s2951_s5 }
  0x2a   :  { %p2245_p4 = pnand %p2243_p3, %p2240_p2 }
  0x2c   :  { %2248 = shalt.err (!%p2245_p4)
}
  0x2d   :  { %s2249_s3 = scalar_lea.vmem %s79_s27, 1024  ;;  %p2254_p6 = scmp.lt.s32.totalorder %s79_s27, %s79_s27 }
  0x2e   :  { %p2250_p5 = scmp.ne.s32.totalorder %s79_s27, %s2249_s3  ;;  %p2255_p7 = scmp.lt.s32.totalorder %s2249_s3, %s2249_s3 }
  0x30   :  { %p2256_p8 = por %p2255_p7, %p2254_p6 }
  0x32   :  { %p2257_p9 = pnand %p2256_p8, %p2250_p5 }
  0x34   :  { %2260 = shalt.err (!%p2257_p9)
}
  0x35   :  { %s2419_s14 = smov 64   ;;  %s2420_s15 = smov 4  }
  0x36   :  { %84 = dma.hbm_to_vmem [thread:$0]  %s2951_s5, 1024, %s79_s27, [#allocation13], %s2419_s14, %s2419_s14, %s2420_s15  }
  0x37   :  { %s2261_s20 = scalar_lea.hbm %s2946_s0, 512 }
  0x38   :  { %p2262_p10 = scmp.ne.s32.totalorder %s2946_s0, %s2261_s20  ;;  %p2265_p11 = scmp.lt.u32.totalorder %s2261_s20, %s2946_s0 }
  0x3a   :  { %p2267_p12 = pnand %p2265_p11, %p2262_p10 }
  0x3c   :  { %2270 = shalt.err (!%p2267_p12)
}
  0x3d   :  { %s2271_s26 = scalar_lea.vmem %s2497_s29, 512  ;;  %p2276_p0 = scmp.lt.s32.totalorder %s2497_s29, %s2497_s29 }
  0x3e   :  { %p2272_p13 = scmp.ne.s32.totalorder %s2497_s29, %s2271_s26  ;;  %p2277_p1 = scmp.lt.s32.totalorder %s2271_s26, %s2271_s26 }
  0x40   :  { %p2278_p2 = por %p2277_p1, %p2276_p0 }
  0x42   :  { %p2279_p3 = pnand %p2278_p2, %p2272_p13 }
  0x44   :  { %2282 = shalt.err (!%p2279_p3)
}
  0x45   :  { %28 = dma.hbm_to_vmem [thread:$0]  %s2946_s0, 512, %s2497_s29, [#allocation4], %s2419_s14, %s2419_s14, %s2420_s15  }
  0x46   :  { %s2421_s28 = smov [#allocation8]   ;;  %s2422_s8 = smov [#allocation11]  }
  0x47   :  { %s44_s30 = sshll.u32 %s2421_s28, 4  ;;  %s69_s9 = sshll.u32 %s2422_s8, 4  ;;  %s45_s30 = int_to_ptr.vmem [resolvable:$true] %s44_s30  ;;  %s70_s9 = int_to_ptr.vmem [resolvable:$true] %s69_s9 }
  0x48   :  { %s2283_s12 = scalar_lea.hbm %s2948_s2, 4096 }
  0x49   :  { %p2284_p4 = scmp.ne.s32.totalorder %s2948_s2, %s2283_s12  ;;  %p2287_p5 = scmp.lt.u32.totalorder %s2283_s12, %s2948_s2 }
  0x4b   :  { %p2289_p6 = pnand %p2287_p5, %p2284_p4 }
  0x4d   :  { %2292 = shalt.err (!%p2289_p6)
}
  0x4e   :  { %s2293_s0 = scalar_lea.vmem %s45_s30, 4096  ;;  %p2298_p8 = scmp.lt.s32.totalorder %s45_s30, %s45_s30 }
  0x4f   :  { %p2294_p7 = scmp.ne.s32.totalorder %s45_s30, %s2293_s0  ;;  %p2299_p9 = scmp.lt.s32.totalorder %s2293_s0, %s2293_s0 }
  0x51   :  { %p2300_p10 = por %p2299_p9, %p2298_p8 }
  0x53   :  { %p2301_p11 = pnand %p2300_p10, %p2294_p7 }
  0x55   :  { %2304 = shalt.err (!%p2301_p11)
}
  0x56   :  { %50 = dma.hbm_to_vmem [thread:$0]  %s2948_s2, 4096, %s45_s30, [#allocation7], %s2415_s1, %s2415_s1, %s2416_s23  }
  0x57   :  { %s2305_s19 = scalar_lea.hbm %s2950_s4, 64 }
  0x58   :  { %p2306_p12 = scmp.ne.s32.totalorder %s2950_s4, %s2305_s19  ;;  %p2309_p13 = scmp.lt.u32.totalorder %s2305_s19, %s2950_s4 }
  0x5a   :  { %p2311_p0 = pnand %p2309_p13, %p2306_p12 }
  0x5c   :  { %2314 = shalt.err (!%p2311_p0)
}
  0x5d   :  { %s2315_s25 = scalar_lea.vmem %s70_s9, 64  ;;  %p2320_p2 = scmp.lt.s32.totalorder %s70_s9, %s70_s9 }
  0x5e   :  { %p2316_p1 = scmp.ne.s32.totalorder %s70_s9, %s2315_s25  ;;  %p2321_p3 = scmp.lt.s32.totalorder %s2315_s25, %s2315_s25 }
  0x60   :  { %p2322_p4 = por %p2321_p3, %p2320_p2 }
  0x62   :  { %p2323_p5 = pnand %p2322_p4, %p2316_p1 }
  0x64   :  { %2326 = shalt.err (!%p2323_p5)
}
  0x65   :  { %72 = dma.hbm_to_vmem [thread:$0]  %s2950_s4, 64, %s70_s9, [#allocation10]  }
  0x66   :  { %s2423_s23 = smov [#allocation14]   ;;  %s2327_s28 = scalar_lea.hbm %s2952_s6, 16 }
  0x67   :  { %s91_s26 = sshll.u32 %s2423_s23, 4  ;;  %p2328_p6 = scmp.ne.s32.totalorder %s2952_s6, %s2327_s28  ;;  %s92_s26 = int_to_ptr.vmem [resolvable:$true] %s91_s26 }
  0x68   :  { %p2331_p7 = scmp.lt.u32.totalorder %s2327_s28, %s2952_s6 }
  0x6a   :  { %p2333_p8 = pnand %p2331_p7, %p2328_p6 }
  0x6c   :  { %2336 = shalt.err (!%p2333_p8)
}
  0x6d   :  { %s2337_s12 = scalar_lea.vmem %s92_s26, 16  ;;  %s2341_s4 = scalar_lea.vmem %s92_s26, 32 }
  0x6e   :  { %p2338_p9 = scmp.ne.s32.totalorder %s92_s26, %s2337_s12  ;;  %p2342_p10 = scmp.lt.s32.totalorder %s92_s26, %s92_s26 }
  0x6f   :  { %p2343_p11 = scmp.lt.s32.totalorder %s2341_s4, %s2337_s12 }
  0x71   :  { %p2344_p12 = por %p2343_p11, %p2342_p10 }
  0x73   :  { %p2345_p13 = pnand %p2344_p12, %p2338_p9 }
  0x75   :  { %2348 = shalt.err (!%p2345_p13)
}
  0x76   :  { %94 = dma.hbm_to_vmem [thread:$0]  %s2952_s6, 16, %s92_s26, [#allocation13]  }
  0x77   :  { %2387 = dma.done.wait [#allocation4], 512  }
  0x78   :  { %2388 = vsyncadd [#allocation4], 4294966784 }
  0x79   :  { %2389 = dma.done.wait [#allocation7], 4224  }
  0x7a   :  { %2390 = vsyncadd [#allocation7], 4294963072 }
  0x7b   :  { %2391 = dma.done.wait [#allocation10], 4160  }
  0x7c   :  { %2392 = vsyncadd [#allocation10], 4294963136 }
  0x7d   :  { %2393 = dma.done.wait [#allocation13], 1040  }
  0x7e   :  { %2394 = vsyncadd [#allocation13], 4294966256  ;;  %v2424_v0 = vmov 0   ;;  %v2569_v1 = vld [vmem:[#allocation6] sm:$0xff]  ;;  %v1973_v2 = vld [vmem:[#allocation8 + $0x4] ss:$16 sps:$4 sm:$0xff]   ;;  %v156_v36 = vlaneseq }
  0x7f   :  { %380 = vmatprep.mubr.bf16.mxu0 %v2424_v0  ;;  %433 = vmatprep.mubr.bf16.mxu1 %v2424_v0  ;;  %v1975_v3 = vld [vmem:[#allocation8 + $0xc] ss:$16 sps:$4 sm:$0xff]   ;;  %v1977_v4 = vld [vmem:[#allocation8] ss:$16 sps:$4 sm:$0xff]   ;;  %v1978_v5 = vld [vmem:[#allocation8 + $0x8] ss:$16 sps:$4 sm:$0xff]  }
  0x80   :  { %348 = vmatprep.subr.bf16.mxu0 %v1973_v2  ;;  %v1979_v6 = vld [vmem:[#allocation8 + $0x24] ss:$16 sps:$4 sm:$0xff]   ;;  %401 = vmatprep.subr.bf16.mxu1 %v1975_v3  ;;  %v1981_v7 = vld [vmem:[#allocation8 + $0x2c] ss:$16 sps:$4 sm:$0xff]   ;;  %v1983_v8 = vld [vmem:[#allocation8 + $0x20] ss:$16 sps:$4 sm:$0xff]  }
  0x81   :  { %349 = vmatpush1.bf16.msra.mxu0 %v1977_v4  ;;  %402 = vmatpush1.bf16.msra.mxu1 %v1978_v5  ;;  %v1984_v9 = vld [vmem:[#allocation8 + $0x28] ss:$16 sps:$4 sm:$0xff]   ;;  %v1985_v10 = vld [vmem:[#allocation8 + $0x44] ss:$16 sps:$4 sm:$0xff]   ;;  %v1987_v11 = vld [vmem:[#allocation8 + $0x4c] ss:$16 sps:$4 sm:$0xff]  }
  0x82   :  { %350 = vmatprep.subr.bf16.mxu0 %v1979_v6  ;;  %403 = vmatprep.subr.bf16.mxu1 %v1981_v7  ;;  %v1989_v12 = vld [vmem:[#allocation8 + $0x40] ss:$16 sps:$4 sm:$0xff]   ;;  %v1990_v13 = vld [vmem:[#allocation8 + $0x48] ss:$16 sps:$4 sm:$0xff]   ;;  %v1991_v14 = vld [vmem:[#allocation8 + $0x64] ss:$16 sps:$4 sm:$0xff]  }
  0x83   :  { %v1993_v15 = vld [vmem:[#allocation8 + $0x6c] ss:$16 sps:$4 sm:$0xff]   ;;  %v1995_v16 = vld [vmem:[#allocation8 + $0x60] ss:$16 sps:$4 sm:$0xff]   ;;  %v1996_v17 = vld [vmem:[#allocation8 + $0x68] ss:$16 sps:$4 sm:$0xff]  }
  0x84   :  { %v1997_v18 = vld [vmem:[#allocation8 + $0x84] ss:$16 sps:$4 sm:$0xff]   ;;  %v1999_v19 = vld [vmem:[#allocation8 + $0x8c] ss:$16 sps:$4 sm:$0xff]   ;;  %v2001_v20 = vld [vmem:[#allocation8 + $0x80] ss:$16 sps:$4 sm:$0xff]  }
  0x85   :  { %351 = vmatpush1.bf16.msra.mxu0 %v1983_v8  ;;  %404 = vmatpush1.bf16.msra.mxu1 %v1984_v9  ;;  %v2002_v21 = vld [vmem:[#allocation8 + $0x88] ss:$16 sps:$4 sm:$0xff]   ;;  %v2003_v22 = vld [vmem:[#allocation8 + $0xa4] ss:$16 sps:$4 sm:$0xff]   ;;  %v2005_v23 = vld [vmem:[#allocation8 + $0xac] ss:$16 sps:$4 sm:$0xff]  }
  0x86   :  { %352 = vmatprep.subr.bf16.mxu0 %v1985_v10  ;;  %405 = vmatprep.subr.bf16.mxu1 %v1987_v11  ;;  %v2007_v24 = vld [vmem:[#allocation8 + $0xa0] ss:$16 sps:$4 sm:$0xff]   ;;  %v2008_v25 = vld [vmem:[#allocation8 + $0xa8] ss:$16 sps:$4 sm:$0xff]   ;;  %v2009_v26 = vld [vmem:[#allocation8 + $0xc4] ss:$16 sps:$4 sm:$0xff]  }
  0x87   :  { %v2011_v27 = vld [vmem:[#allocation8 + $0xcc] ss:$16 sps:$4 sm:$0xff]   ;;  %v2013_v28 = vld [vmem:[#allocation8 + $0xc0] ss:$16 sps:$4 sm:$0xff]   ;;  %v2014_v29 = vld [vmem:[#allocation8 + $0xc8] ss:$16 sps:$4 sm:$0xff]  }
  0x88   :  { %v2015_v30 = vld [vmem:[#allocation8 + $0xe4] ss:$16 sps:$4 sm:$0xff]   ;;  %v2017_v31 = vld [vmem:[#allocation8 + $0xec] ss:$16 sps:$4 sm:$0xff]   ;;  %v2019_v32 = vld [vmem:[#allocation8 + $0xe0] ss:$16 sps:$4 sm:$0xff]  }
  0x89   :  { %353 = vmatpush1.bf16.msra.mxu0 %v1989_v12  ;;  %406 = vmatpush1.bf16.msra.mxu1 %v1990_v13  ;;  %v2020_v33 = vld [vmem:[#allocation8 + $0xe8] ss:$16 sps:$4 sm:$0xff]   ;;  %v2022_v35 = vld [vmem:[#allocation3 + $0x8] sm:$0xff]   ;;  %v2573_v37 = vshrl.u32 %v156_v36, 7  ;;  %s2593_s6 = smov 0  }
  0x8a   :  { %354 = vmatprep.subr.bf16.mxu0 %v1991_v14  ;;  %407 = vmatprep.subr.bf16.mxu1 %v1993_v15  ;;  %v2021_v34 = vld [vmem:[#allocation3] sm:$0xff]   ;;  %v154_v39 = vld [vmem:[#allocation11] sm:$0xf] }
  0x8b   :  { %v158_v38 = vsub.s32 0, %v2573_v37  ;;  %v166_v40 = vsub.s32 2, %v2573_v37  ;;  %v162_v41 = vsub.s32 1, %v2573_v37  ;;  %v170_v42 = vsub.s32 3, %v2573_v37 }
  0x8d   :  { %355 = vmatpush1.bf16.msra.mxu0 %v1995_v16  ;;  %408 = vmatpush1.bf16.msra.mxu1 %v1996_v17  ;;  %v159_v43 = vrot.slane %v154_v39, %v158_v38  ;;  %v167_v44 = vrot.slane %v154_v39, %v166_v40  ;;  %v163_v45 = vrot.slane %v154_v39, %v162_v41  ;;  %v2587_v16 = vmov 0.0  }
  0x8e   :  { %356 = vmatprep.subr.bf16.mxu0 %v1997_v18  ;;  %409 = vmatprep.subr.bf16.mxu1 %v1999_v19  ;;  %v171_v46 = vrot.slane %v154_v39, %v170_v42  ;;  %v2589_v17 = vmov 0.0   ;;  %v2591_v18 = vmov 0.0  }
  0x91   :  { %357 = vmatpush1.bf16.msra.mxu0 %v2001_v20  ;;  %410 = vmatpush1.bf16.msra.mxu1 %v2002_v21 }
  0x92   :  { %358 = vmatprep.subr.bf16.mxu0 %v2003_v22  ;;  %411 = vmatprep.subr.bf16.mxu1 %v2005_v23 }
  0x95   :  { %359 = vmatpush1.bf16.msra.mxu0 %v2007_v24  ;;  %412 = vmatpush1.bf16.msra.mxu1 %v2008_v25 }
  0x96   :  { %360 = vmatprep.subr.bf16.mxu0 %v2009_v26  ;;  %413 = vmatprep.subr.bf16.mxu1 %v2011_v27 }
  0x99   :  { %361 = vmatpush1.bf16.msra.mxu0 %v2013_v28  ;;  %414 = vmatpush1.bf16.msra.mxu1 %v2014_v29 }
  0x9a   :  { %362 = vmatprep.subr.bf16.mxu0 %v2015_v30  ;;  %415 = vmatprep.subr.bf16.mxu1 %v2017_v31 }
  0x9d   :  { %363 = vmatpush1.bf16.msra.mxu0 %v2019_v32  ;;  %416 = vmatpush1.bf16.msra.mxu1 %v2020_v33 }
  0xa0   :  { %381 = vmatmul.mubr.bf16.vlgmr.msra.gmra.mrb[0].mxu0 %v2021_v34  ;;  %434 = vmatmul.mubr.bf16.vlgmr.msra.gmra.mrb[0].mxu1 %v2021_v34 }
  0xa1   :  { %390 = vmatprep.mubr.bf16.mxu0 %v2424_v0  ;;  %443 = vmatprep.mubr.bf16.mxu1 %v2424_v0 }
  0xa8   :  { %391 = vmatmul.mubr.bf16.gmra.mrb[4].mxu0 %v2022_v35  ;;  %444 = vmatmul.mubr.bf16.gmra.mrb[4].mxu1 %v2022_v35 }
 0x173   :  { %v382_v47 = vpop.f32.mrb[0].mxu0  ;;  %v435_v49 = vpop.f32.mrb[0].mxu1 }
 0x174   :  { %v383_v48 = vadd.f32 %v382_v47, %v159_v43  ;;  %v384_v50 = vpop.f32.mrb[1].mxu0  ;;  %v436_v51 = vadd.f32 %v435_v49, %v167_v44  ;;  %v437_v53 = vpop.f32.mrb[1].mxu1 }
 0x175   :  { %v385_v52 = vadd.f32 %v384_v50, %v163_v45  ;;  %v386_v54 = vpop.f32.mrb[2].mxu0  ;;  %v438_v55 = vadd.f32 %v437_v53, %v171_v46  ;;  %v439_v57 = vpop.f32.mrb[2].mxu1 }
 0x176   :  { %454 = vst [vmem:[#allocation2] sm:$0xff] %v383_v48  ;;  %v387_v56 = vadd.f32 %v386_v54, %v159_v43  ;;  %v388_v58 = vpop.f32.mrb[3].mxu0  ;;  %456 = vst [vmem:[#allocation2 + $0x10] sm:$0xff] %v436_v51  ;;  %v440_v59 = vadd.f32 %v439_v57, %v167_v44  ;;  %v441_v61 = vpop.f32.mrb[3].mxu1 }
 0x177   :  { %455 = vst [vmem:[#allocation2 + $0x8] sm:$0xff] %v385_v52  ;;  %v389_v60 = vadd.f32 %v388_v58, %v163_v45  ;;  %457 = vst [vmem:[#allocation2 + $0x18] sm:$0xff] %v438_v55  ;;  %v442_v62 = vadd.f32 %v441_v61, %v171_v46 }
 0x178   :  { %458 = vst [vmem:[#allocation2 + $0x20] sm:$0xff] %v387_v56  ;;  %460 = vst [vmem:[#allocation2 + $0x30] sm:$0xff] %v440_v59 }
 0x179   :  { %459 = vst [vmem:[#allocation2 + $0x28] sm:$0xff] %v389_v60  ;;  %461 = vst [vmem:[#allocation2 + $0x38] sm:$0xff] %v442_v62 }
 0x17b   :  { %v392_v63 = vpop.f32.mrb[4].mxu0  ;;  %v445_v2 = vpop.f32.mrb[4].mxu1 }
 0x17c   :  { %v393_v0 = vadd.f32 %v392_v63, %v159_v43  ;;  %v394_v3 = vpop.f32.mrb[5].mxu0  ;;  %v446_v4 = vadd.f32 %v445_v2, %v167_v44  ;;  %v447_v6 = vpop.f32.mrb[5].mxu1 }
 0x17d   :  { %v395_v5 = vadd.f32 %v394_v3, %v163_v45  ;;  %v396_v7 = vpop.f32.mrb[6].mxu0  ;;  %v448_v8 = vadd.f32 %v447_v6, %v171_v46  ;;  %v449_v10 = vpop.f32.mrb[6].mxu1 }
 0x17e   :  { %462 = vst [vmem:[#allocation2 + $0x40] sm:$0xff] %v393_v0  ;;  %v397_v9 = vadd.f32 %v396_v7, %v159_v43  ;;  %v398_v11 = vpop.f32.mrb[7].mxu0  ;;  %464 = vst [vmem:[#allocation2 + $0x50] sm:$0xff] %v446_v4  ;;  %v450_v12 = vadd.f32 %v449_v10, %v167_v44  ;;  %v451_v14 = vpop.f32.mrb[7].mxu1 }
 0x17f   :  { %463 = vst [vmem:[#allocation2 + $0x48] sm:$0xff] %v395_v5  ;;  %v399_v13 = vadd.f32 %v398_v11, %v163_v45  ;;  %465 = vst [vmem:[#allocation2 + $0x58] sm:$0xff] %v448_v8  ;;  %v452_v15 = vadd.f32 %v451_v14, %v171_v46 }
 0x180   :  { %466 = vst [vmem:[#allocation2 + $0x60] sm:$0xff] %v397_v9  ;;  %468 = vst [vmem:[#allocation2 + $0x70] sm:$0xff] %v450_v12 }
 0x181   :  { %467 = vst [vmem:[#allocation2 + $0x68] sm:$0xff] %v399_v13  ;;  %469 = vst [vmem:[#allocation2 + $0x78] sm:$0xff] %v452_v15 }
 0x182 LB: > { %p479_p0 = scmp.lt.s32.totalorder %s2411_s6, 0  ;;  %s480_s3 = ssub.s32 0, %s2411_s6  ;;  %s2411_s6 = sphi %s2593_s6, %s2957_s6   ;;  %v2407_v18 = vphi %v2591_v18, %v1570_v18   ;;  %v2403_v17 = vphi %v2589_v17, %v2956_v17   ;;  %v2399_v16 = vphi %v2587_v16, %v2955_v16  }
 0x183   : > { %s1772_s16 = smin.u32 %s2411_s6, %s480_s3  ;;  %s491_s17 = sadd.s32 1, %s2411_s6  }
 0x184   : > { %s482_s0 = sand.u32 1, %s1772_s16   ;;  %p2615_p2 = scmp.ge.s32.totalorder %s491_s17, 2 }
 0x185   : > { %s483_s29 = ssub.s32 0, %s482_s0  ;;  %v2023_v19 = vld [vmem:[#allocation8 + $0x4] ss:$16 sps:$4 sm:$0xff] (!%p2615_p2)   ;;  %v2025_v20 = vld [vmem:[#allocation8 + $0xc] ss:$16 sps:$4 sm:$0xff] (!%p2615_p2)   ;;  %v2425_v21 = vmov (!%p2615_p2), 0  }
 0x186   : > { %s2959_s29 = smov (!%p479_p0, %s483_s29), %s482_s0  ;;  %495 = sbr.rel (%p2615_p2) target bundleno = 650 (0x28a), region = 68 }
 0x187   : > { %p1774_p1 = scmp.lt.s32.totalorder %s2959_s29, 0  ;;  %s489_s14 = sadd.s32 2, %s2959_s29  ;;  %764 = vmatprep.mubr.bf16.mxu0 (!%p2615_p2), %v2425_v21  ;;  %817 = vmatprep.mubr.bf16.mxu1 (!%p2615_p2), %v2425_v21  ;;  %v2027_v22 = vld [vmem:[#allocation8] ss:$16 sps:$4 sm:$0xff] (!%p2615_p2)   ;;  %v2028_v23 = vld [vmem:[#allocation8 + $0x8] ss:$16 sps:$4 sm:$0xff] (!%p2615_p2)  }
 0x188   : > { %732 = vmatprep.subr.bf16.mxu0 (!%p2615_p2), %v2023_v19  ;;  %785 = vmatprep.subr.bf16.mxu1 (!%p2615_p2), %v2025_v20  ;;  %v2029_v24 = vld [vmem:[#allocation8 + $0x24] ss:$16 sps:$4 sm:$0xff] (!%p2615_p2)   ;;  %v2031_v25 = vld [vmem:[#allocation8 + $0x2c] ss:$16 sps:$4 sm:$0xff] (!%p2615_p2)   ;;  %v2033_v26 = vld [vmem:[#allocation8 + $0x20] ss:$16 sps:$4 sm:$0xff] (!%p2615_p2)  }
 0x189   : > { %s2961_s14 = smov (!%p1774_p1, %s489_s14), %s2959_s29  ;;  %733 = vmatpush1.bf16.msra.mxu0 (!%p2615_p2), %v2027_v22  ;;  %786 = vmatpush1.bf16.msra.mxu1 (!%p2615_p2), %v2028_v23  ;;  %v2034_v27 = vld [vmem:[#allocation8 + $0x28] ss:$16 sps:$4 sm:$0xff] (!%p2615_p2)   ;;  %v2035_v28 = vld [vmem:[#allocation8 + $0x44] ss:$16 sps:$4 sm:$0xff] (!%p2615_p2)   ;;  %v2037_v29 = vld [vmem:[#allocation8 + $0x4c] ss:$16 sps:$4 sm:$0xff] (!%p2615_p2)  }
 0x18a   : > { %734 = vmatprep.subr.bf16.mxu0 (!%p2615_p2), %v2029_v24  ;;  %787 = vmatprep.subr.bf16.mxu1 (!%p2615_p2), %v2031_v25  ;;  %v2039_v30 = vld [vmem:[#allocation8 + $0x40] ss:$16 sps:$4 sm:$0xff] (!%p2615_p2)   ;;  %v2040_v31 = vld [vmem:[#allocation8 + $0x48] ss:$16 sps:$4 sm:$0xff] (!%p2615_p2)   ;;  %v2041_v32 = vld [vmem:[#allocation8 + $0x64] ss:$16 sps:$4 sm:$0xff] (!%p2615_p2)  }
 0x18b   : > { %s1888_s18 = sshll.u32 (!%p2615_p2), %s2411_s6, 5  ;;  %v2043_v33 = vld [vmem:[#allocation8 + $0x6c] ss:$16 sps:$4 sm:$0xff] (!%p2615_p2)   ;;  %v2045_v34 = vld [vmem:[#allocation8 + $0x60] ss:$16 sps:$4 sm:$0xff] (!%p2615_p2)   ;;  %s497_s24 = ssub.s32 (!%p2615_p2), 1, %s2961_s14 }
 0x18c   : > { %s1889_s19 = sadd.s32 (!%p2615_p2), 32, %s1888_s18  ;;  %v2046_v35 = vld [vmem:[#allocation8 + $0x68] ss:$16 sps:$4 sm:$0xff] (!%p2615_p2)   ;;  %v2047_v36 = vld [vmem:[#allocation8 + $0x84] ss:$16 sps:$4 sm:$0xff] (!%p2615_p2)   ;;  %s1890_s25 = sshll.u32 (!%p2615_p2), %s497_s24, 7 }
 0x18d   : > { %735 = vmatpush1.bf16.msra.mxu0 %v2033_v26  ;;  %788 = vmatpush1.bf16.msra.mxu1 %v2034_v27  ;;  %v2049_v39 = vld [vmem:[#allocation8 + $0x8c] ss:$16 sps:$4 sm:$0xff]   ;;  %s498_s20 = sshra.s32 %s1889_s19, 3  ;;  %v2051_v43 = vld [vmem:[#allocation8 + $0x80] ss:$16 sps:$4 sm:$0xff]   ;;  %s2638_s2 = scalar_lea.vmem [#allocation2], %s1890_s25 }
 0x18e   : > { %736 = vmatprep.subr.bf16.mxu0 %v2035_v28  ;;  %789 = vmatprep.subr.bf16.mxu1 %v2037_v29  ;;  %v2052_v44 = vld [vmem:[#allocation8 + $0x88] ss:$16 sps:$4 sm:$0xff]   ;;  %v2053_v45 = vld [vmem:[#allocation8 + $0xa4] ss:$16 sps:$4 sm:$0xff]   ;;  %v2055_v46 = vld [vmem:[#allocation8 + $0xac] ss:$16 sps:$4 sm:$0xff]  }
 0x18f   : > { %s2624_s21 = sshll.u32 %s498_s20, 2  ;;  %v2057_v47 = vld [vmem:[#allocation8 + $0xa0] ss:$16 sps:$4 sm:$0xff]   ;;  %v2058_v48 = vld [vmem:[#allocation8 + $0xa8] ss:$16 sps:$4 sm:$0xff]  }
 0x190   : > { %v2059_v49 = vld [vmem:[#allocation8 + $0xc4] ss:$16 sps:$4 sm:$0xff]   ;;  %v2061_v50 = vld [vmem:[#allocation8 + $0xcc] ss:$16 sps:$4 sm:$0xff]   ;;  %s501_s22 = scalar_lea.vmem [#allocation3], %s2624_s21 }
 0x191   : > { %737 = vmatpush1.bf16.msra.mxu0 %v2039_v30  ;;  %790 = vmatpush1.bf16.msra.mxu1 %v2040_v31  ;;  %v2063_v51 = vld [vmem:[#allocation8 + $0xc0] ss:$16 sps:$4 sm:$0xff]   ;;  %v2064_v52 = vld [vmem:[#allocation8 + $0xc8] ss:$16 sps:$4 sm:$0xff]   ;;  %v2065_v53 = vld [vmem:[#allocation8 + $0xe4] ss:$16 sps:$4 sm:$0xff]  }
 0x192   : > { %738 = vmatprep.subr.bf16.mxu0 %v2041_v32  ;;  %791 = vmatprep.subr.bf16.mxu1 %v2043_v33  ;;  %v2067_v54 = vld [vmem:[#allocation8 + $0xec] ss:$16 sps:$4 sm:$0xff]   ;;  %v2069_v55 = vld [vmem:[#allocation8 + $0xe0] ss:$16 sps:$4 sm:$0xff]   ;;  %v2070_v56 = vld [vmem:[#allocation8 + $0xe8] ss:$16 sps:$4 sm:$0xff]  }
 0x193   : > { %v2071_v57 = vld [vmem:[%s501_s22] sm:$0xff]   ;;  %v2072_v58 = vld [vmem:[%s501_s22 + $0x8] sm:$0xff]  }
 0x194   : > { %v538_v59 = vld [vmem:[#allocation11] sm:$0xf] }
 0x195   : > { %739 = vmatpush1.bf16.msra.mxu0 %v2045_v34  ;;  %792 = vmatpush1.bf16.msra.mxu1 %v2046_v35  ;;  %v543_v60 = vrot.slane %v538_v59, %v158_v38  ;;  %v551_v61 = vrot.slane %v538_v59, %v166_v40  ;;  %v547_v62 = vrot.slane %v538_v59, %v162_v41 }
 0x196   : > { %740 = vmatprep.subr.bf16.mxu0 %v2047_v36  ;;  %793 = vmatprep.subr.bf16.mxu1 %v2049_v39  ;;  %v555_v63 = vrot.slane %v538_v59, %v170_v42 }
 0x199   : > { %741 = vmatpush1.bf16.msra.mxu0 %v2051_v43  ;;  %794 = vmatpush1.bf16.msra.mxu1 %v2052_v44 }
 0x19a   : > { %742 = vmatprep.subr.bf16.mxu0 %v2053_v45  ;;  %795 = vmatprep.subr.bf16.mxu1 %v2055_v46 }
 0x19d   : > { %743 = vmatpush1.bf16.msra.mxu0 %v2057_v47  ;;  %796 = vmatpush1.bf16.msra.mxu1 %v2058_v48 }
 0x19e   : > { %744 = vmatprep.subr.bf16.mxu0 %v2059_v49  ;;  %797 = vmatprep.subr.bf16.mxu1 %v2061_v50 }
 0x1a1   : > { %745 = vmatpush1.bf16.msra.mxu0 %v2063_v51  ;;  %798 = vmatpush1.bf16.msra.mxu1 %v2064_v52 }
 0x1a2   : > { %746 = vmatprep.subr.bf16.mxu0 %v2065_v53  ;;  %799 = vmatprep.subr.bf16.mxu1 %v2067_v54 }
 0x1a5   : > { %747 = vmatpush1.bf16.msra.mxu0 %v2069_v55  ;;  %800 = vmatpush1.bf16.msra.mxu1 %v2070_v56 }
 0x1a8   : > { %765 = vmatmul.mubr.bf16.vlgmr.msra.gmra.mrb[0].mxu0 %v2071_v57  ;;  %818 = vmatmul.mubr.bf16.vlgmr.msra.gmra.mrb[0].mxu1 %v2071_v57 }
 0x1a9   : > { %774 = vmatprep.mubr.bf16.mxu0 %v2425_v21  ;;  %827 = vmatprep.mubr.bf16.mxu1 %v2425_v21 }
 0x1b0   : > { %775 = vmatmul.mubr.bf16.gmra.mrb[4].mxu0 %v2072_v58  ;;  %828 = vmatmul.mubr.bf16.gmra.mrb[4].mxu1 %v2072_v58 }
 0x27b   : > { %v766_v0 = vpop.f32.mrb[0].mxu0  ;;  %v819_v2 = vpop.f32.mrb[0].mxu1 }
 0x27c   : > { %v767_v3 = vadd.f32 %v766_v0, %v543_v60  ;;  %v820_v4 = vadd.f32 %v819_v2, %v551_v61  ;;  %v768_v5 = vpop.f32.mrb[1].mxu0  ;;  %v821_v6 = vpop.f32.mrb[1].mxu1 }
 0x27d   : > { %v769_v7 = vadd.f32 %v768_v5, %v547_v62  ;;  %v822_v8 = vadd.f32 %v821_v6, %v555_v63  ;;  %v770_v9 = vpop.f32.mrb[2].mxu0  ;;  %v823_v10 = vpop.f32.mrb[2].mxu1 }
 0x27e   : > { %841 = vst [vmem:[%s2638_s2] sm:$0xff] %v767_v3  ;;  %843 = vst [vmem:[%s2638_s2 + $0x10] sm:$0xff] %v820_v4  ;;  %v771_v11 = vadd.f32 %v770_v9, %v543_v60  ;;  %v824_v12 = vadd.f32 %v823_v10, %v551_v61  ;;  %v772_v13 = vpop.f32.mrb[3].mxu0  ;;  %v825_v14 = vpop.f32.mrb[3].mxu1 }
 0x27f   : > { %842 = vst [vmem:[%s2638_s2 + $0x8] sm:$0xff] %v769_v7  ;;  %844 = vst [vmem:[%s2638_s2 + $0x18] sm:$0xff] %v822_v8  ;;  %v773_v15 = vadd.f32 %v772_v13, %v547_v62  ;;  %v826_v19 = vadd.f32 %v825_v14, %v555_v63 }
 0x280   : > { %845 = vst [vmem:[%s2638_s2 + $0x20] sm:$0xff] %v771_v11  ;;  %847 = vst [vmem:[%s2638_s2 + $0x30] sm:$0xff] %v824_v12 }
 0x281   : > { %846 = vst [vmem:[%s2638_s2 + $0x28] sm:$0xff] %v773_v15  ;;  %848 = vst [vmem:[%s2638_s2 + $0x38] sm:$0xff] %v826_v19 }
 0x283   : > { %v776_v20 = vpop.f32.mrb[4].mxu0  ;;  %v829_v21 = vpop.f32.mrb[4].mxu1 }
 0x284   : > { %v777_v22 = vadd.f32 %v776_v20, %v543_v60  ;;  %v830_v23 = vadd.f32 %v829_v21, %v551_v61  ;;  %v778_v24 = vpop.f32.mrb[5].mxu0  ;;  %v831_v25 = vpop.f32.mrb[5].mxu1 }
 0x285   : > { %v779_v26 = vadd.f32 %v778_v24, %v547_v62  ;;  %v832_v27 = vadd.f32 %v831_v25, %v555_v63  ;;  %v780_v28 = vpop.f32.mrb[6].mxu0  ;;  %v833_v29 = vpop.f32.mrb[6].mxu1 }
 0x286   : > { %849 = vst [vmem:[%s2638_s2 + $0x40] sm:$0xff] %v777_v22  ;;  %851 = vst [vmem:[%s2638_s2 + $0x50] sm:$0xff] %v830_v23  ;;  %v781_v30 = vadd.f32 %v780_v28, %v543_v60  ;;  %v834_v31 = vadd.f32 %v833_v29, %v551_v61  ;;  %v782_v32 = vpop.f32.mrb[7].mxu0  ;;  %v835_v33 = vpop.f32.mrb[7].mxu1 }
 0x287   : > { %850 = vst [vmem:[%s2638_s2 + $0x48] sm:$0xff] %v779_v26  ;;  %852 = vst [vmem:[%s2638_s2 + $0x58] sm:$0xff] %v832_v27  ;;  %v783_v34 = vadd.f32 %v782_v32, %v547_v62  ;;  %v836_v35 = vadd.f32 %v835_v33, %v555_v63 }
 0x288   : > { %853 = vst [vmem:[%s2638_s2 + $0x60] sm:$0xff] %v781_v30  ;;  %855 = vst [vmem:[%s2638_s2 + $0x70] sm:$0xff] %v834_v31 }
 0x289   : > { %854 = vst [vmem:[%s2638_s2 + $0x68] sm:$0xff] %v783_v34  ;;  %856 = vst [vmem:[%s2638_s2 + $0x78] sm:$0xff] %v836_v35 }
 0x28a PF: > { %v2656_v36 = vld [vmem:[#allocation9 + $0x4] ss:$16 sps:$4 sm:$0xff]   ;;  %s2659_s1 = sshll.u32 %s2411_s6, 2  ;;  %v2661_v39 = vld [vmem:[#allocation9] ss:$16 sps:$4 sm:$0xff]   ;;  %v2426_v43 = vmov 0   ;;  %v867_v14 = vpack.c.bf16 %v2407_v18, %v2407_v18  ;;  %s2957_s6 = smov %s491_s17 }
 0x28b   : > { %1092 = vmatprep.mubr.bf16.mxu0 %v2426_v43  ;;  %1133 = vmatprep.mubr.bf16.mxu1 %v2426_v43  ;;  %v1170_v44 = vstv %s2659_s1  ;;  %s1181_s23 = sadd.s32 1, %s2659_s1  ;;  %v2668_v45 = vld [vmem:[#allocation9 + $0x24] ss:$16 sps:$4 sm:$0xff]   ;;  %v2673_v47 = vld [vmem:[#allocation9 + $0x20] ss:$16 sps:$4 sm:$0xff]   ;;  %s1891_s26 = sshll.u32 %s2961_s14, 7 }
 0x28c   : > { %1060 = vmatprep.subr.bf16.mxu0 %v2656_v36  ;;  %2073 = vset.pattern.permute.xlu0 %v2426_v43  ;;  %vm1171_vm0 = vcmp.gt.s32.totalorder %v2569_v1, %v1170_v44  ;;  %v1301_v46 = vstv %s1181_s23  ;;  %v2679_v49 = vld [vmem:[#allocation9 + $0x44] ss:$16 sps:$4 sm:$0xff]   ;;  %v2681_v50 = vld [vmem:[#allocation9 + $0xc] ss:$16 sps:$4 sm:$0xff]   ;;  %v2683_v51 = vld [vmem:[#allocation9 + $0x8] ss:$16 sps:$4 sm:$0xff]  }
 0x28d   : > { %1061 = vmatpush1.bf16.msra.mxu0 %v2661_v39  ;;  %v1172_v48 = vsel %vm1171_vm0, 1, %v2426_v43  ;;  %vm1302_vm1 = vcmp.gt.s32.totalorder %v2569_v1, %v1301_v46  ;;  %2074 = vset.pattern.permute.xlu1 %v2426_v43  ;;  %v2687_v53 = vld [vmem:[#allocation9 + $0x40] ss:$16 sps:$4 sm:$0xff]   ;;  %v2691_v54 = vld [vmem:[#allocation9 + $0x64] ss:$16 sps:$4 sm:$0xff]   ;;  %s2804_s5 = scalar_lea.vmem [#allocation2], %s1891_s26 }
 0x28e   : > { %1062 = vmatprep.subr.bf16.mxu0 %v2668_v45  ;;  %1174 = vperm.xlu0 %2073, %v1172_v48   ;;  %v1303_v52 = vsel %vm1302_vm1, 1, %v2426_v43  ;;  %v2694_v55 = vld [vmem:[#allocation9 + $0x2c] ss:$16 sps:$4 sm:$0xff]   ;;  %v2696_v56 = vld [vmem:[#allocation9 + $0x28] ss:$16 sps:$4 sm:$0xff]   ;;  %s1312_s27 = sadd.s32 2, %s2659_s1 }
 0x28f   : > { %1101 = vmatprep.subr.bf16.mxu1 %v2681_v50  ;;  %v2700_v57 = vld [vmem:[#allocation9 + $0x60] ss:$16 sps:$4 sm:$0xff]   ;;  %v2702_v58 = vld [vmem:[#allocation9 + $0x84] ss:$16 sps:$4 sm:$0xff]   ;;  %v2704_v59 = vld [vmem:[#allocation9 + $0x4c] ss:$16 sps:$4 sm:$0xff]  }
 0x290   : > { %1102 = vmatpush1.bf16.msra.mxu1 %v2683_v51  ;;  %v2708_v60 = vld [vmem:[#allocation9 + $0x48] ss:$16 sps:$4 sm:$0xff]   ;;  %v2711_v61 = vld [vmem:[#allocation9 + $0x6c] ss:$16 sps:$4 sm:$0xff]   ;;  %v2714_v62 = vld [vmem:[#allocation9 + $0x80] ss:$16 sps:$4 sm:$0xff]  }
 0x291   : > { %1063 = vmatpush1.bf16.msra.mxu0 %v2673_v47  ;;  %1103 = vmatprep.subr.bf16.mxu1 %v2694_v55  ;;  %v2717_v63 = vld [vmem:[#allocation9 + $0xa4] ss:$16 sps:$4 sm:$0xff]   ;;  %v2720_v0 = vld [vmem:[#allocation9 + $0x68] ss:$16 sps:$4 sm:$0xff]   ;;  %v2723_v2 = vld [vmem:[#allocation9 + $0x8c] ss:$16 sps:$4 sm:$0xff]  }
 0x292   : > { %1064 = vmatprep.subr.bf16.mxu0 %v2679_v49  ;;  %1305 = vperm.xlu0 %2073, %v1303_v52   ;;  %v2726_v3 = vld [vmem:[#allocation9 + $0xa0] ss:$16 sps:$4 sm:$0xff]   ;;  %v2728_v4 = vld [vmem:[#allocation9 + $0xc4] ss:$16 sps:$4 sm:$0xff]   ;;  %v2732_v5 = vld [vmem:[#allocation9 + $0x88] ss:$16 sps:$4 sm:$0xff]  }
 0x293   : > { %v2735_v6 = vld [vmem:[#allocation9 + $0xac] ss:$16 sps:$4 sm:$0xff]   ;;  %v2738_v7 = vld [vmem:[#allocation9 + $0xc0] ss:$16 sps:$4 sm:$0xff]   ;;  %v2741_v8 = vld [vmem:[#allocation9 + $0xe4] ss:$16 sps:$4 sm:$0xff]  }
 0x294   : > { %1104 = vmatpush1.bf16.msra.mxu1 %v2696_v56  ;;  %v2744_v9 = vld [vmem:[#allocation9 + $0xa8] ss:$16 sps:$4 sm:$0xff]   ;;  %v2747_v10 = vld [vmem:[#allocation9 + $0xcc] ss:$16 sps:$4 sm:$0xff]   ;;  %v2750_v11 = vld [vmem:[#allocation9 + $0xe0] ss:$16 sps:$4 sm:$0xff]  }
 0x295   : > { %1065 = vmatpush1.bf16.msra.mxu0 %v2687_v53  ;;  %1105 = vmatprep.subr.bf16.mxu1 %v2704_v59  ;;  %v2754_v12 = vld [vmem:[#allocation9 + $0xc8] ss:$16 sps:$4 sm:$0xff]   ;;  %v2757_v13 = vld [vmem:[#allocation9 + $0xec] ss:$16 sps:$4 sm:$0xff]   ;;  %v864_v20 = vld [vmem:[%s2804_s5 + $0x8] sm:$0xff]  ;;  %s1443_s28 = sadd.s32 3, %s2659_s1 }
 0x296   : > { %1066 = vmatprep.subr.bf16.mxu0 %v2691_v54  ;;  %v2763_v15 = vld [vmem:[#allocation9 + $0xe8] ss:$16 sps:$4 sm:$0xff]   ;;  %v866_v29 = vld [vmem:[%s2804_s5 + $0x18] sm:$0xff]  ;;  %vm2428_vm8 = vmmov (%p2615_p2), 0   ;;  %v2194_v37 = vld [vmem:[#allocation12 + $0x38] sm:$0xff] (%p2615_p2)   ;;  %s2429_s30 = smov (%p2615_p2), [#allocation15]  }
 0x297   : > { %v863_v19 = vld [vmem:[%s2804_s5] sm:$0xff]  ;;  %v865_v35 = vld [vmem:[%s2804_s5 + $0x10] sm:$0xff]  ;;  %v1879_v40 = vld [vmem:[#allocation14] ss:$0 sm:$0xff] (%p2615_p2)  ;;  %s1693_s8 = sshll.u32 (%p2615_p2), %s2429_s30, 4  ;;  %s1694_s8 = int_to_ptr.vmem [resolvable:$true] %s1693_s8 }
 0x298   : > { %1106 = vmatpush1.bf16.msra.mxu1 %v2708_v60  ;;  %s2349_s10 = scalar_lea.vmem (%p2615_p2), %s1694_s8, 128  ;;  %p2354_p4 = scmp.lt.s32.totalorder (%p2615_p2), %s1694_s8, %s1694_s8 }
 0x299   : > { %1067 = vmatpush1.bf16.msra.mxu0 %v2700_v57  ;;  %1107 = vmatprep.subr.bf16.mxu1 %v2711_v61  ;;  %p2350_p3 = scmp.ne.s32.totalorder (%p2615_p2), %s1694_s8, %s2349_s10  ;;  %p2355_p5 = scmp.lt.s32.totalorder (%p2615_p2), %s2349_s10, %s2349_s10 }
 0x29a   : > { %1068 = vmatprep.subr.bf16.mxu0 %v2702_v58 }
 0x29b   :  { %p2356_p6 = por (%p2615_p2), %p2355_p5, %p2354_p4 }
 0x29c   : > { %1108 = vmatpush1.bf16.msra.mxu1 %v2720_v0 }
 0x29d   : > { %1069 = vmatpush1.bf16.msra.mxu0 %v2714_v62  ;;  %1109 = vmatprep.subr.bf16.mxu1 %v2723_v2  ;;  %p2357_p7 = pnand (%p2615_p2), %p2356_p6, %p2350_p3 }
 0x29e   : > { %1070 = vmatprep.subr.bf16.mxu0 %v2717_v63 }
 0x2a0   : > { %1110 = vmatpush1.bf16.msra.mxu1 %v2732_v5 }
 0x2a1   : > { %1071 = vmatpush1.bf16.msra.mxu0 %v2726_v3  ;;  %1111 = vmatprep.subr.bf16.mxu1 %v2735_v6 }
 0x2a2   : > { %1072 = vmatprep.subr.bf16.mxu0 %v2728_v4 }
 0x2a4   : > { %1112 = vmatpush1.bf16.msra.mxu1 %v2744_v9 }
 0x2a5   : > { %1073 = vmatpush1.bf16.msra.mxu0 %v2738_v7  ;;  %1113 = vmatprep.subr.bf16.mxu1 %v2747_v10 }
 0x2a6   : > { %1074 = vmatprep.subr.bf16.mxu0 %v2741_v8 }
 0x2a8   : > { %1114 = vmatpush1.bf16.msra.mxu1 %v2754_v12 }
 0x2a9   : > { %1075 = vmatpush1.bf16.msra.mxu0 %v2750_v11  ;;  %1115 = vmatprep.subr.bf16.mxu1 %v2757_v13 }
 0x2aa   : > { %1191 = vmatprep.subr.bf16.mxu0 %v2656_v36 }
 0x2ac   : > { %1093 = vmatmul.mubr.bf16.vlgmr.msra.gmra.mrb[0].mxu0 %v867_v14  ;;  %1116 = vmatpush1.bf16.msra.mxu1 %v2763_v15 }
 0x2ad   : > { %1192 = vmatpush1.bf16.msra.mxu0 %v2661_v39  ;;  %1223 = vmatprep.mubr.bf16.mxu0 %v2426_v43 }
 0x2ae   : > { %1193 = vmatprep.subr.bf16.mxu0 %v2668_v45  ;;  %1232 = vmatprep.subr.bf16.mxu1 %v2681_v50 }
 0x2af   : > { %1134 = vmatmul.mubr.bf16.vlgmr.msra.gmra.mrb[0].mxu1 %v867_v14 }
 0x2b0   : > { %1233 = vmatpush1.bf16.msra.mxu1 %v2683_v51  ;;  %1264 = vmatprep.mubr.bf16.mxu1 %v2426_v43 }
 0x2b1   : > { %1194 = vmatpush1.bf16.msra.mxu0 %v2673_v47  ;;  %1234 = vmatprep.subr.bf16.mxu1 %v2694_v55 }
 0x2b2   : > { %1195 = vmatprep.subr.bf16.mxu0 %v2679_v49 }
 0x2b4   : > { %1235 = vmatpush1.bf16.msra.mxu1 %v2696_v56 }
 0x2b5   : > { %1196 = vmatpush1.bf16.msra.mxu0 %v2687_v53  ;;  %1236 = vmatprep.subr.bf16.mxu1 %v2704_v59 }
 0x2b6   : > { %1197 = vmatprep.subr.bf16.mxu0 %v2691_v54 }
 0x2b8   : > { %1237 = vmatpush1.bf16.msra.mxu1 %v2708_v60 }
 0x2b9   : > { %1198 = vmatpush1.bf16.msra.mxu0 %v2700_v57  ;;  %1238 = vmatprep.subr.bf16.mxu1 %v2711_v61 }
 0x2ba   : > { %1199 = vmatprep.subr.bf16.mxu0 %v2702_v58 }
 0x2bc   : > { %1239 = vmatpush1.bf16.msra.mxu1 %v2720_v0 }
 0x2bd   : > { %1200 = vmatpush1.bf16.msra.mxu0 %v2714_v62  ;;  %1240 = vmatprep.subr.bf16.mxu1 %v2723_v2 }
 0x2be   : > { %1201 = vmatprep.subr.bf16.mxu0 %v2717_v63 }
 0x2c0   : > { %1241 = vmatpush1.bf16.msra.mxu1 %v2732_v5 }
 0x2c1   : > { %1202 = vmatpush1.bf16.msra.mxu0 %v2726_v3  ;;  %1242 = vmatprep.subr.bf16.mxu1 %v2735_v6 }
 0x2c2   : > { %1203 = vmatprep.subr.bf16.mxu0 %v2728_v4 }
 0x2c4   : > { %1243 = vmatpush1.bf16.msra.mxu1 %v2744_v9 }
 0x2c5   : > { %1204 = vmatpush1.bf16.msra.mxu0 %v2738_v7  ;;  %1244 = vmatprep.subr.bf16.mxu1 %v2747_v10 }
 0x2c6   : > { %1205 = vmatprep.subr.bf16.mxu0 %v2741_v8 }
 0x2c8   : > { %1245 = vmatpush1.bf16.msra.mxu1 %v2754_v12 }
 0x2c9   : > { %1206 = vmatpush1.bf16.msra.mxu0 %v2750_v11  ;;  %1246 = vmatprep.subr.bf16.mxu1 %v2757_v13 }
 0x2ca   : > { %1322 = vmatprep.subr.bf16.mxu0 %v2656_v36 }
 0x2cc   : > { %1247 = vmatpush1.bf16.msra.mxu1 %v2763_v15 }
 0x2cd   : > { %1363 = vmatprep.subr.bf16.mxu1 %v2681_v50 }
 0x37f   : > { %v1094_v21 = vpop.f32.mrb[0].mxu0 }
 0x380   : > { %v1142_v22 = vadd.f32 %v1094_v21, %v863_v19  ;;  %v1096_v23 = vpop.f32.mrb[1].mxu0 }
 0x381   : > { %v1143_v24 = vadd.f32 %v1096_v23, %v864_v20  ;;  %v1098_v25 = vpop.f32.mrb[2].mxu0 }
 0x382   : > { %v1849_v26 = vmul.f32 -1.442695, %v1142_v22  ;;  %v1099_v27 = vpop.f32.mrb[3].mxu0  ;;  %v1135_v30 = vpop.f32.mrb[0].mxu1 }
 0x383   : > { %v1850_v28 = vmul.f32 -1.442695, %v1143_v24  ;;  %v1137_v31 = vpop.f32.mrb[1].mxu1  ;;  %v1144_v46 = vadd.f32 %v1135_v30, %v865_v35  ;;  %v1175_v24 = vpop.permute.xlu0 %1174 }
 0x384   : > { %2123 = vpow2.f32 %v1849_v26  ;;  %v1145_v32 = vadd.f32 %v1137_v31, %v866_v29  ;;  %v1139_v33 = vpop.f32.mrb[2].mxu1  ;;  %vm1176_vm2 = vcmp.eq.s32.totalorder %v1175_v24, 1 }
 0x385   : > { %2125 = vpow2.f32 %v1850_v28  ;;  %v1140_v34 = vpop.f32.mrb[3].mxu1 }
 0x386   : > { %v1851_v44 = vmul.f32 -1.442695, %v1145_v32 }
 0x388   : > { %2127 = vpow2.f32 %v1851_v44 }
 0x389   : > { %2129 = vtanh.f32 %v1144_v46 }
 0x38e   : > { %v2124_v48 = vpop.eup %2123 }
 0x38f   : > { %v2126_v52 = vpop.eup %2125  ;;  %v1149_v14 = vadd.f32 1.0, %v2124_v48  ;;  %v1854_v48 = vld [vmem:[%s2804_s5 + $0x20] sm:$0xff] }
 0x390   : > { %v1155_v19 = vadd.f32 1.0, %v2126_v52  ;;  %v1855_v52 = vld [vmem:[%s2804_s5 + $0x28] sm:$0xff] }
 0x391   : > { %2131 = vrcp.f32 %v1149_v14 }
 0x392   : > { %2133 = vrcp.f32 %v1155_v19  ;;  %v2128_v20 = vpop.eup %2127 }
 0x393   : > { %v2130_v21 = vpop.eup %2129  ;;  %v1162_v23 = vadd.f32 1.0, %v2128_v20 }
 0x395   : > { %2135 = vrcp.f32 %v1162_v23 }
 0x39b   : > { %v2132_v22 = vpop.eup %2131 }
 0x39c   : > { %v2134_v25 = vpop.eup %2133  ;;  %v1166_v26 = vmul.f32 %v2132_v22, %v2130_v21 }
 0x39d   : > { %v1165_v27 = vmul.f32 %v2403_v17, %v2134_v25 }
 0x39f   : > { %v1167_v28 = vadd.f32 %v1166_v26, %v1165_v27  ;;  %v2136_v30 = vpop.eup %2135 }
 0x3a1   : > { %2137 = vtanh.f32 %v1167_v28  ;;  %v2812_v29 = vsel %vm1176_vm2, %v1167_v28, %v2403_v17  ;;  %v1432_v17 = vstv %s1312_s27  ;;  %v1857_v28 = vld [vmem:[%s2804_s5 + $0x38] sm:$0xff] }
 0x3a2   : > { %vm1433_vm3 = vcmp.gt.s32.totalorder %v2569_v1, %v1432_v17 }
 0x3a3   : > { %v1434_v44 = vsel %vm1433_vm3, 1, %v2426_v43 }
 0x3a4   : > { %1436 = vperm.xlu1 %2074, %v1434_v44  }
 0x3ab   : > { %v2138_v31 = vpop.eup %2137 }
 0x3ac   : > { %v1169_v32 = vmul.f32 %v2138_v31, %v2136_v30  ;;  %v1856_v31 = vld [vmem:[%s2804_s5 + $0x30] sm:$0xff] }
 0x3ae   : > { %v2815_v33 = vsel %vm1176_vm2, %v1169_v32, %v2407_v18  ;;  %v2817_v34 = vsel %vm1176_vm2, %v1169_v32, 0.0  ;;  %v1563_v18 = vstv %s1443_s28 }
 0x3af   : > { %v1190_v35 = vpack.c.bf16 %v2815_v33, %v2815_v33  ;;  %vm1564_vm4 = vcmp.gt.s32.totalorder %v2569_v1, %v1563_v18  ;;  %v2193_v1 = vld [vmem:[#allocation12 + $0x30] sm:$0xff] (%p2615_p2)  }
 0x3b0   : > { %v1565_v46 = vsel %vm1564_vm4, 1, %v2426_v43 }
 0x3b1   : > { %1224 = vmatmul.mubr.bf16.vlgmr.msra.gmra.mrb[4].mxu0 %v1190_v35  ;;  %1265 = vmatmul.mubr.bf16.vlgmr.msra.gmra.mrb[4].mxu1 %v1190_v35 }
 0x3b2   : > { %1323 = vmatpush1.bf16.msra.mxu0 %v2661_v39  ;;  %1364 = vmatpush1.bf16.msra.mxu1 %v2683_v51 }
 0x3b3   : > { %1324 = vmatprep.subr.bf16.mxu0 %v2668_v45  ;;  %1365 = vmatprep.subr.bf16.mxu1 %v2694_v55 }
 0x3b4   : > { %1354 = vmatprep.mubr.bf16.mxu0 %v2426_v43  ;;  %1395 = vmatprep.mubr.bf16.mxu1 %v2426_v43 }
 0x3b5   : > { %1567 = vperm.xlu1 %2074, %v1565_v46  }
 0x3b6   : > { %1325 = vmatpush1.bf16.msra.mxu0 %v2673_v47  ;;  %1366 = vmatpush1.bf16.msra.mxu1 %v2696_v56 }
 0x3b7   : > { %1326 = vmatprep.subr.bf16.mxu0 %v2679_v49  ;;  %1367 = vmatprep.subr.bf16.mxu1 %v2704_v59 }
 0x3ba   : > { %1327 = vmatpush1.bf16.msra.mxu0 %v2687_v53  ;;  %1368 = vmatpush1.bf16.msra.mxu1 %v2708_v60 }
 0x3bb   : > { %1328 = vmatprep.subr.bf16.mxu0 %v2691_v54  ;;  %1369 = vmatprep.subr.bf16.mxu1 %v2711_v61 }
 0x3be   : > { %1329 = vmatpush1.bf16.msra.mxu0 %v2700_v57  ;;  %1370 = vmatpush1.bf16.msra.mxu1 %v2720_v0 }
 0x3bf   : > { %1330 = vmatprep.subr.bf16.mxu0 %v2702_v58  ;;  %1371 = vmatprep.subr.bf16.mxu1 %v2723_v2 }
 0x3c2   : > { %1331 = vmatpush1.bf16.msra.mxu0 %v2714_v62  ;;  %1372 = vmatpush1.bf16.msra.mxu1 %v2732_v5 }
 0x3c3   : > { %1332 = vmatprep.subr.bf16.mxu0 %v2717_v63  ;;  %1373 = vmatprep.subr.bf16.mxu1 %v2735_v6 }
 0x3c6   : > { %1333 = vmatpush1.bf16.msra.mxu0 %v2726_v3  ;;  %1374 = vmatpush1.bf16.msra.mxu1 %v2744_v9 }
 0x3c7   : > { %1334 = vmatprep.subr.bf16.mxu0 %v2728_v4  ;;  %1375 = vmatprep.subr.bf16.mxu1 %v2747_v10 }
 0x3ca   : > { %1335 = vmatpush1.bf16.msra.mxu0 %v2738_v7  ;;  %1376 = vmatpush1.bf16.msra.mxu1 %v2754_v12 }
 0x3cb   : > { %1336 = vmatprep.subr.bf16.mxu0 %v2741_v8  ;;  %1377 = vmatprep.subr.bf16.mxu1 %v2757_v13 }
 0x3ce   : > { %1337 = vmatpush1.bf16.msra.mxu0 %v2750_v11  ;;  %1378 = vmatpush1.bf16.msra.mxu1 %v2763_v15 }
 0x3cf   : > { %1453 = vmatprep.subr.bf16.mxu0 %v2656_v36  ;;  %1494 = vmatprep.subr.bf16.mxu1 %v2681_v50 }
 0x484   : > { %v1225_v36 = vpop.f32.mrb[4].mxu0  ;;  %v1266_v50 = vpop.f32.mrb[4].mxu1 }
 0x485   : > { %v1273_v14 = vadd.f32 %v1854_v48, %v1225_v36  ;;  %v1227_v19 = vpop.f32.mrb[5].mxu0  ;;  %v1268_v20 = vpop.f32.mrb[5].mxu1  ;;  %v1275_v35 = vadd.f32 %v1856_v31, %v1266_v50 }
 0x486   : > { %v1274_v21 = vadd.f32 %v1855_v52, %v1227_v19  ;;  %v1229_v22 = vpop.f32.mrb[6].mxu0  ;;  %v1270_v23 = vpop.f32.mrb[6].mxu1  ;;  %v1276_v30 = vadd.f32 %v1857_v28, %v1268_v20 }
 0x487   : > { %v1858_v24 = vmul.f32 -1.442695, %v1273_v14  ;;  %v1230_v25 = vpop.f32.mrb[7].mxu0  ;;  %v1271_v26 = vpop.f32.mrb[7].mxu1 }
 0x488   : > { %v1859_v27 = vmul.f32 -1.442695, %v1274_v21  ;;  %v1860_v32 = vmul.f32 -1.442695, %v1276_v30  ;;  %v1306_v22 = vpop.permute.xlu0 %1305 }
 0x489   : > { %2139 = vpow2.f32 %v1858_v24  ;;  %vm1307_vm5 = vcmp.eq.s32.totalorder %v1306_v22, 1 }
 0x48a   : > { %2141 = vpow2.f32 %v1859_v27  ;;  %v1180_v27 = vadd.f32 %v2399_v16, %v2817_v34  ;;  %v1863_v16 = vld [vmem:[%s2804_s5 + $0x40] sm:$0xff] }
 0x48b   : > { %2143 = vpow2.f32 %v1860_v32 }
 0x48c   : > { %2145 = vtanh.f32 %v1275_v35 }
 0x493   : > { %v2140_v17 = vpop.eup %2139 }
 0x494   : > { %v2142_v18 = vpop.eup %2141  ;;  %v1280_v44 = vadd.f32 1.0, %v2140_v17 }
 0x495   : > { %v1286_v46 = vadd.f32 1.0, %v2142_v18  ;;  %v2144_v48 = vpop.eup %2143 }
 0x496   : > { %2147 = vrcp.f32 %v1280_v44  ;;  %v2146_v52 = vpop.eup %2145  ;;  %v1293_v21 = vadd.f32 1.0, %v2144_v48  ;;  %v1872_v48 = vld [vmem:[%s2804_s5 + $0x60] sm:$0xff] }
 0x497   : > { %2149 = vrcp.f32 %v1286_v46 }
 0x498   : > { %2151 = vrcp.f32 %v1293_v21 }
 0x4a0   : > { %v2148_v36 = vpop.eup %2147 }
 0x4a1   : > { %v2150_v14 = vpop.eup %2149  ;;  %v1297_v19 = vmul.f32 %v2148_v36, %v2146_v52  ;;  %v1873_v52 = vld [vmem:[%s2804_s5 + $0x68] sm:$0xff] }
 0x4a2   : > { %v1296_v20 = vmul.f32 %v2150_v14, %v2812_v29  ;;  %v2152_v24 = vpop.eup %2151 }
 0x4a4   : > { %v1298_v23 = vadd.f32 %v1297_v19, %v1296_v20 }
 0x4a6   : > { %2153 = vtanh.f32 %v1298_v23  ;;  %v2867_v50 = vsel %vm1307_vm5, %v1298_v23, %v2812_v29 }
 0x4b0   : > { %v2154_v25 = vpop.eup %2153 }
 0x4b1   : > { %v1300_v26 = vmul.f32 %v2154_v25, %v2152_v24 }
 0x4b3   : > { %v2872_v28 = vsel %vm1307_vm5, %v1300_v26, %v2815_v33  ;;  %v1310_v30 = vsel %vm1307_vm5, %v1300_v26, 0.0 }
 0x4b4   : > { %v1321_v31 = vpack.c.bf16 %v2872_v28, %v2872_v28  ;;  %v2876_v32 = vadd.f32 %v1310_v30, %v1180_v27 }
 0x4b6   : > { %1355 = vmatmul.mubr.bf16.vlgmr.msra.gmra.mrb[8].mxu0 %v1321_v31  ;;  %1396 = vmatmul.mubr.bf16.vlgmr.msra.gmra.mrb[8].mxu1 %v1321_v31  ;;  %v1874_v31 = vld [vmem:[%s2804_s5 + $0x70] sm:$0xff] }
 0x4b7   : > { %1454 = vmatpush1.bf16.msra.mxu0 %v2661_v39  ;;  %1495 = vmatpush1.bf16.msra.mxu1 %v2683_v51  ;;  %v1864_v39 = vld [vmem:[%s2804_s5 + $0x48] sm:$0xff] }
 0x4b8   : > { %1455 = vmatprep.subr.bf16.mxu0 %v2668_v45  ;;  %1496 = vmatprep.subr.bf16.mxu1 %v2694_v55 }
 0x4b9   : > { %1485 = vmatprep.mubr.bf16.mxu0 %v2426_v43  ;;  %1526 = vmatprep.mubr.bf16.mxu1 %v2426_v43 }
 0x4bb   : > { %1456 = vmatpush1.bf16.msra.mxu0 %v2673_v47  ;;  %1497 = vmatpush1.bf16.msra.mxu1 %v2696_v56 }
 0x4bc   : > { %1457 = vmatprep.subr.bf16.mxu0 %v2679_v49  ;;  %1498 = vmatprep.subr.bf16.mxu1 %v2704_v59 }
 0x4bf   : > { %1458 = vmatpush1.bf16.msra.mxu0 %v2687_v53  ;;  %1499 = vmatpush1.bf16.msra.mxu1 %v2708_v60  ;;  %v1866_v60 = vld [vmem:[%s2804_s5 + $0x58] sm:$0xff] }
 0x4c0   : > { %1459 = vmatprep.subr.bf16.mxu0 %v2691_v54  ;;  %1500 = vmatprep.subr.bf16.mxu1 %v2711_v61 }
 0x4c3   : > { %1460 = vmatpush1.bf16.msra.mxu0 %v2700_v57  ;;  %1501 = vmatpush1.bf16.msra.mxu1 %v2720_v0 }
 0x4c4   : > { %1461 = vmatprep.subr.bf16.mxu0 %v2702_v58  ;;  %1502 = vmatprep.subr.bf16.mxu1 %v2723_v2 }
 0x4c7   : > { %1462 = vmatpush1.bf16.msra.mxu0 %v2714_v62  ;;  %1503 = vmatpush1.bf16.msra.mxu1 %v2732_v5  ;;  %v1865_v62 = vld [vmem:[%s2804_s5 + $0x50] sm:$0xff] }
 0x4c8   : > { %1463 = vmatprep.subr.bf16.mxu0 %v2717_v63  ;;  %1504 = vmatprep.subr.bf16.mxu1 %v2735_v6 }
 0x4cb   : > { %1464 = vmatpush1.bf16.msra.mxu0 %v2726_v3  ;;  %1505 = vmatpush1.bf16.msra.mxu1 %v2744_v9  ;;  %v1437_v9 = vpop.permute.xlu1 %1436 }
 0x4cc   : > { %1465 = vmatprep.subr.bf16.mxu0 %v2728_v4  ;;  %1506 = vmatprep.subr.bf16.mxu1 %v2747_v10  ;;  %vm1438_vm6 = vcmp.eq.s32.totalorder %v1437_v9, 1  ;;  %v2192_v9 = vld [vmem:[#allocation12 + $0x28] sm:$0xff] (%p2615_p2)  }
 0x4cf   : > { %1466 = vmatpush1.bf16.msra.mxu0 %v2738_v7  ;;  %1507 = vmatpush1.bf16.msra.mxu1 %v2754_v12 }
 0x4d0   : > { %1467 = vmatprep.subr.bf16.mxu0 %v2741_v8  ;;  %1508 = vmatprep.subr.bf16.mxu1 %v2757_v13 }
 0x4d3   : > { %1468 = vmatpush1.bf16.msra.mxu0 %v2750_v11  ;;  %1509 = vmatpush1.bf16.msra.mxu1 %v2763_v15 }
 0x589   : > { %v1356_v43 = vpop.f32.mrb[8].mxu0  ;;  %v1397_v45 = vpop.f32.mrb[8].mxu1 }
 0x58a   : > { %v1404_v47 = vadd.f32 %v1863_v16, %v1356_v43  ;;  %v1358_v49 = vpop.f32.mrb[9].mxu0  ;;  %v1399_v51 = vpop.f32.mrb[9].mxu1  ;;  %v1406_v0 = vadd.f32 %v1865_v62, %v1397_v45 }
 0x58b   : > { %v1405_v53 = vadd.f32 %v1864_v39, %v1358_v49  ;;  %v1360_v54 = vpop.f32.mrb[10].mxu0  ;;  %v1401_v55 = vpop.f32.mrb[10].mxu1  ;;  %v1407_v61 = vadd.f32 %v1866_v60, %v1399_v51 }
 0x58c   : > { %v1867_v56 = vmul.f32 -1.442695, %v1404_v47  ;;  %v1361_v57 = vpop.f32.mrb[11].mxu0  ;;  %v1402_v58 = vpop.f32.mrb[11].mxu1 }
 0x58d   : > { %v1868_v59 = vmul.f32 -1.442695, %v1405_v53  ;;  %v1869_v63 = vmul.f32 -1.442695, %v1407_v61  ;;  %v1568_v57 = vpop.permute.xlu1 %1567 }
 0x58e   : > { %2155 = vpow2.f32 %v1867_v56  ;;  %vm1569_vm7 = vcmp.eq.s32.totalorder %v1568_v57, 1 }
 0x58f   : > { %2157 = vpow2.f32 %v1868_v59 }
 0x590   : > { %2159 = vpow2.f32 %v1869_v63 }
 0x591   : > { %2161 = vtanh.f32 %v1406_v0 }
 0x598   : > { %v2156_v2 = vpop.eup %2155 }
 0x599   : > { %v2158_v3 = vpop.eup %2157  ;;  %v1411_v4 = vadd.f32 1.0, %v2156_v2 }
 0x59a   : > { %v1417_v5 = vadd.f32 1.0, %v2158_v3  ;;  %v2160_v6 = vpop.eup %2159  ;;  %v2187_v3 = vld [vmem:[#allocation12] sm:$0xff] (%p2615_p2)  }
 0x59b   : > { %2163 = vrcp.f32 %v1411_v4  ;;  %v2162_v7 = vpop.eup %2161  ;;  %v1424_v11 = vadd.f32 1.0, %v2160_v6  ;;  %v2427_v4 = vmov (%p2615_p2), 0.0   ;;  %v2189_v6 = vld [vmem:[#allocation12 + $0x10] sm:$0xff] (%p2615_p2)  }
 0x59c   : > { %2165 = vrcp.f32 %v1417_v5  ;;  %1904 = vmatprep.subr.bf16.mxu0 (%p2615_p2), %v2427_v4  ;;  %v2188_v5 = vld [vmem:[#allocation12 + $0x8] sm:$0xff] (%p2615_p2)  }
 0x59d   : > { %2167 = vrcp.f32 %v1424_v11 }
 0x5a5   : > { %v2164_v8 = vpop.eup %2163 }
 0x5a6   : > { %v2166_v10 = vpop.eup %2165  ;;  %v1428_v12 = vmul.f32 %v2164_v8, %v2162_v7  ;;  %v2190_v7 = vld [vmem:[#allocation12 + $0x18] sm:$0xff] (%p2615_p2)   ;;  %v2191_v8 = vld [vmem:[#allocation12 + $0x20] sm:$0xff] (%p2615_p2)  }
 0x5a7   : > { %v1427_v13 = vmul.f32 %v2166_v10, %v2867_v50  ;;  %v2168_v33 = vpop.eup %2167 }
 0x5a9   : > { %v1429_v15 = vadd.f32 %v1428_v12, %v1427_v13 }
 0x5ab   : > { %2169 = vtanh.f32 %v1429_v15  ;;  %v1440_v29 = vsel %vm1438_vm6, %v1429_v15, %v2867_v50 }
 0x5b5   : > { %v2170_v34 = vpop.eup %2169 }
 0x5b6   : > { %v1431_v35 = vmul.f32 %v2170_v34, %v2168_v33 }
 0x5b8   : > { %v1439_v17 = vsel %vm1438_vm6, %v1431_v35, %v2872_v28  ;;  %v1441_v18 = vsel %vm1438_vm6, %v1431_v35, 0.0  ;;  %v1875_v28 = vld [vmem:[%s2804_s5 + $0x78] sm:$0xff] }
 0x5b9   : > { %v1442_v44 = vadd.f32 %v1441_v18, %v2876_v32  ;;  %v1452_v46 = vpack.c.bf16 %v1439_v17, %v1439_v17 }
 0x5bb   : > { %1486 = vmatmul.mubr.bf16.vlgmr.msra.gmra.mrb[12].mxu0 %v1452_v46  ;;  %1527 = vmatmul.mubr.bf16.vlgmr.msra.gmra.mrb[12].mxu1 %v1452_v46 }
 0x5bc   :  { %1905 = vmatpush3.bf16.msra.mxu0 (%p2615_p2), %v2187_v3  ;;  %1920 = vmatprep.mubr.msk.bf16.mxu0 (%p2615_p2), %vm2428_vm8, %v2427_v4 }
 0x5bd   :  { %1906 = vmatprep.subr.bf16.mxu0 (%p2615_p2), %v2427_v4 }
 0x5c0   :  { %1907 = vmatpush3.bf16.msra.mxu0 (%p2615_p2), %v2188_v5 }
 0x5c1   :  { %1908 = vmatprep.subr.bf16.mxu0 (%p2615_p2), %v2427_v4 }
 0x5c4   :  { %1909 = vmatpush3.bf16.msra.mxu0 (%p2615_p2), %v2189_v6 }
 0x5c5   :  { %1910 = vmatprep.subr.bf16.mxu0 (%p2615_p2), %v2427_v4 }
 0x5c8   :  { %1911 = vmatpush3.bf16.msra.mxu0 (%p2615_p2), %v2190_v7 }
 0x5c9   :  { %1912 = vmatprep.subr.bf16.mxu0 (%p2615_p2), %v2427_v4 }
 0x5cc   :  { %1913 = vmatpush3.bf16.msra.mxu0 (%p2615_p2), %v2191_v8 }
 0x5cd   :  { %1914 = vmatprep.subr.bf16.mxu0 (%p2615_p2), %v2427_v4 }
 0x5d0   :  { %1915 = vmatpush3.bf16.msra.mxu0 (%p2615_p2), %v2192_v9 }
 0x5d1   :  { %1916 = vmatprep.subr.bf16.mxu0 (%p2615_p2), %v2427_v4 }
 0x5d4   :  { %1917 = vmatpush3.bf16.msra.mxu0 (%p2615_p2), %v2193_v1 }
 0x5d5   :  { %1918 = vmatprep.subr.bf16.mxu0 (%p2615_p2), %v2427_v4 }
 0x5d8   :  { %1919 = vmatpush3.bf16.msra.mxu0 (%p2615_p2), %v2194_v37 }
 0x68e   : > { %v1487_v36 = vpop.f32.mrb[12].mxu0  ;;  %v1528_v14 = vpop.f32.mrb[12].mxu1 }
 0x68f   : > { %v1535_v19 = vadd.f32 %v1872_v48, %v1487_v36  ;;  %v1489_v21 = vpop.f32.mrb[13].mxu0  ;;  %v1530_v22 = vpop.f32.mrb[13].mxu1  ;;  %v1537_v16 = vadd.f32 %v1874_v31, %v1528_v14 }
 0x690   : > { %v1536_v20 = vadd.f32 %v1873_v52, %v1489_v21  ;;  %v1491_v23 = vpop.f32.mrb[14].mxu0  ;;  %v1532_v50 = vpop.f32.mrb[14].mxu1  ;;  %v1538_v30 = vadd.f32 %v1875_v28, %v1530_v22 }
 0x691   : > { %v1876_v24 = vmul.f32 -1.442695, %v1535_v19  ;;  %v1492_v25 = vpop.f32.mrb[15].mxu0  ;;  %v1533_v26 = vpop.f32.mrb[15].mxu1 }
 0x692   : > { %v1877_v27 = vmul.f32 -1.442695, %v1536_v20  ;;  %v1878_v32 = vmul.f32 -1.442695, %v1538_v30 }
 0x693   : > { %2171 = vpow2.f32 %v1876_v24 }
 0x694   : > { %2173 = vpow2.f32 %v1877_v27 }
 0x695   : > { %2175 = vpow2.f32 %v1878_v32 }
 0x696   : > { %2177 = vtanh.f32 %v1537_v16 }
 0x69d   : > { %v2172_v39 = vpop.eup %2171 }
 0x69e   : > { %v2174_v43 = vpop.eup %2173  ;;  %v1542_v45 = vadd.f32 1.0, %v2172_v39 }
 0x69f   : > { %v1548_v47 = vadd.f32 1.0, %v2174_v43  ;;  %v2176_v49 = vpop.eup %2175 }
 0x6a0   : > { %2179 = vrcp.f32 %v1542_v45  ;;  %v2178_v51 = vpop.eup %2177  ;;  %v1555_v56 = vadd.f32 1.0, %v2176_v49 }
 0x6a1   : > { %2181 = vrcp.f32 %v1548_v47 }
 0x6a2   : > { %2183 = vrcp.f32 %v1555_v56 }
 0x6aa   : > { %v2180_v53 = vpop.eup %2179 }
 0x6ab   : > { %v2182_v54 = vpop.eup %2181  ;;  %v1559_v55 = vmul.f32 %v2180_v53, %v2178_v51 }
 0x6ac   : > { %v1558_v58 = vmul.f32 %v2182_v54, %v1440_v29  ;;  %v2184_v61 = vpop.eup %2183 }
 0x6ae   : > { %v1560_v59 = vadd.f32 %v1559_v55, %v1558_v58 }
 0x6b0   : > { %2185 = vtanh.f32 %v1560_v59  ;;  %v1571_v60 = vsel %vm1569_vm7, %v1560_v59, %v1440_v29  }
 0x6ba   : > { %v2186_v62 = vpop.eup %2185  ;;  %474 = sbr.rel (!%p2615_p2) target bundleno = 386 (0x182), region = 93 }
 0x6bb   : > { %v1562_v63 = vmul.f32 %v2186_v62, %v2184_v61 }
 0x6bd   : > { %v1570_v18 = vsel %vm1569_vm7, %v1562_v63, %v1439_v17   ;;  %v1572_v0 = vsel %vm1569_vm7, %v1562_v63, 0.0  ;;  %v2956_v17 = vmov %v1571_v60 }
 0x6be   : > { %v1573_v2 = vadd.f32 %v1572_v0, %v1442_v44  }
 0x6c0   : > { %v2955_v16 = vmov %v1573_v2  ;;  %v1574_v38 = vpack.c.bf16 (%p2615_p2), %v1573_v2, %v1573_v2 }
 0x6c2   :  { %1921 = vmatmul.mubr.bf16.vlgmr.msra.gmra.mrb[0].mxu0 %v1574_v38 }
 0x795   :  { %v1680_v41 = vpop.f32.mrb[0].mxu0 }
 0x796   :  { %v1681_v42 = vadd.f32 %v1879_v40, %v1680_v41  ;;  %v1922_v10 = vpop.f32.mrb[1].mxu0 }
 0x797   :  { %v1683_v11 = vpop.f32.mrb[2].mxu0 }
 0x798   :  { %1686 = vst [vmem:[#allocation15] sm:$0xff] %v1681_v42  ;;  %v1923_v12 = vpop.f32.mrb[3].mxu0 }
 0x799   :  { %2360 = shalt.err (!%p2357_p7)
}
 0x79a   :  { %s2361_s4 = scalar_lea.hbm %s2953_s7, 128 }
 0x79b   :  { %p2362_p8 = scmp.ne.s32.totalorder %s2953_s7, %s2361_s4  ;;  %p2365_p9 = scmp.lt.u32.totalorder %s2361_s4, %s2953_s7 }
 0x79d   :  { %p2367_p10 = pnand %p2365_p9, %p2362_p8 }
 0x79f   :  { %2370 = shalt.err (!%p2367_p10)
}
 0x7a0   :  { %1696 = dma.vmem_to_hbm [thread:$0]  %s1694_s8, 128, %s2953_s7, [#allocation5]  }
 0x7a1   :  { %2395 = dma.done.wait [#allocation5], 128  }
 0x7a2   :  { %2396 = vsyncadd [#allocation5], 4294967168 }
 0x7a3   :  { %1700 = vsyncpa [#allocation4], 1 }
 0x7a4   :  { %1701 = vsyncpa [#allocation7], 1 }
 0x7a5   :  { %1702 = vsyncpa [#allocation10], 1 }
 0x7a6   :  { %1703 = vsyncpa [#allocation13], 1 }
 0x7a7   :  { %1704 = vsyncpa [#allocation5], 1 }

</bundles_post_ra>
